<compile_context>
chip_gen: v6e
topology: v6e:2x2x1
jax: 0.10.0
libtpu: 0.0.40
codegen_flags: <defaults>
</compile_context>

<pallas_src>
import functools

import jax
import jax.numpy as jnp
from jax.experimental import pallas as pl
from jax.experimental.pallas import tpu as pltpu

_NEG_BIG = -1e30   # finite "minus infinity" for vocab padding / online-softmax init


def _vmem_limit_bytes():
    # Raise the scoped-VMEM limit (defaults: 16 MiB v5e / 32 MiB v6e,v7x) while
    # staying inside the smallest physical VMEM (64 MiB on v7x).
    try:
        cap = int(pltpu.get_tpu_info().vmem_capacity_bytes)
    except Exception:
        cap = 64 * 1024 * 1024
    return int(max(32 * 1024 * 1024, min(cap - 16 * 1024 * 1024, 100 * 1024 * 1024)))


_VMEM_LIMIT = _vmem_limit_bytes()


def _round_down_mult(x, m):
    return max(m, (x // m) * m)


# --------------------------------------------------------------------------
# Kernel 1: masked L1 + MSE (after/before vs ys, lane-dense flattened layout)
#           + masked BCE-with-logits on the stop-token track (2-D layout)
# --------------------------------------------------------------------------
def _make_spec_bce_kernel(tl, D, bce_pos_weight):
    CH = tl * D

    def kernel(sched_ref, olens_ref, after_ref, before_ref, ys_ref,
               logits_ref, labels_ref, l1_ref, mse_ref, bce_ref):
        i = pl.program_id(0)
        B = olens_ref.shape[0]

        @pl.when(i == 0)
        def _():
            l1_ref[...] = jnp.zeros_like(l1_ref)
            mse_ref[...] = jnp.zeros_like(mse_ref)
            bce_ref[...] = jnp.zeros_like(bce_ref)

        # skip time tiles that are fully padded for the whole batch
        @pl.when(i * tl < sched_ref[0])
        def _():
            rem = olens_ref[...] - i * tl                        # (B, 1) int32

            # ---- masked L1 / MSE on lane-dense flattened spectrograms ----
            # element j of a (B, tl*D) block belongs to frame j // D, so the
            # frame mask (frame < olen) is simply  j < (olen - i*tl) * D.
            jidx = jax.lax.broadcasted_iota(jnp.int32, (B, CH), 1)
            smask = jidx < rem * D                               # (B, CH) bool
            after = after_ref[...].astype(jnp.float32)
            before = before_ref[...].astype(jnp.float32)
            ys = ys_ref[...].astype(jnp.float32)
            da = jnp.where(smask, after - ys, 0.0)               # NaN-safe masking
            db = jnp.where(smask, before - ys, 0.0)
            l1_ref[...] += jnp.sum(jnp.abs(da) + jnp.abs(db), axis=1, keepdims=True)
            mse_ref[...] += jnp.sum(da * da + db * db, axis=1, keepdims=True)

            # ---- masked BCE-with-logits on (B, tl) stop-token blocks ----
            tidx = jax.lax.broadcasted_iota(jnp.int32, (B, tl), 1)
            tmask = tidx < rem                                   # (B, tl) bool
            logits = logits_ref[...].astype(jnp.float32)
            labels = labels_ref[...].astype(jnp.float32)
            bce = (jnp.maximum(logits, 0.0) - logits * labels
                   + jnp.log1p(jnp.exp(-jnp.abs(logits))))
            if bce_pos_weight != 1.0:
                # matches torch BCEWithLogitsLoss pos_weight for hard {0,1} labels
                bce = bce * (1.0 + (bce_pos_weight - 1.0) * labels)
            bce_ref[...] += jnp.sum(jnp.where(tmask, bce, 0.0), axis=1, keepdims=True)

    return kernel


def spec_bce_partial_sums(olens, after, before, ys, logits, labels, *, bce_pos_weight):
    """Per-batch partial sums of masked L1, squared error and stop-token BCE."""
    B, L, D = ys.shape
    spec_isz = jnp.dtype(ys.dtype).itemsize
    tok_isz = jnp.dtype(logits.dtype).itemsize + jnp.dtype(labels.dtype).itemsize

    # time tile sized so double-buffered inputs use ~3/4 of the VMEM limit
    budget = (_VMEM_LIMIT * 3) // 4
    per_frame = 2 * B * (3 * D * spec_isz + tok_isz)     # x2 for double buffering
    cap = _round_down_mult(budget // max(per_frame, 1), 128)
    if L <= cap:
        tl, L_pad = L, L
    else:
        tl = cap
        L_pad = ((L + tl - 1) // tl) * tl

    def pad_t(x):
        if L_pad == L:
            return x
        pad = [(0, 0)] * x.ndim
        pad[1] = (0, L_pad - L)
        return jnp.pad(x, pad)

    after_f = pad_t(after).reshape(B, L_pad * D)
    before_f = pad_t(before).reshape(B, L_pad * D)
    ys_f = pad_t(ys).reshape(B, L_pad * D)
    logits2 = pad_t(logits.reshape(B, L))
    labels2 = pad_t(labels.reshape(B, L))
    olens2 = olens.astype(jnp.int32).reshape(B, 1)

    # scalar-prefetched schedule: [max(olens), last valid time-block index]
    max_olen = jnp.max(olens).astype(jnp.int32)
    last_blk = jnp.maximum((max_olen + tl - 1) // tl - 1, 0).astype(jnp.int32)
    sched = jnp.stack([max_olen, last_blk])

    n_t = L_pad // tl
    CH = tl * D

    def t_map(i, sched):   # clamp past max(olens) so Pallas dedups the DMA
        return (0, jnp.minimum(i, sched[1]))

    return pl.pallas_call(
        _make_spec_bce_kernel(tl, D, bce_pos_weight),
        out_shape=(jax.ShapeDtypeStruct((B, 1), jnp.float32),
                   jax.ShapeDtypeStruct((B, 1), jnp.float32),
                   jax.ShapeDtypeStruct((B, 1), jnp.float32)),
        grid_spec=pltpu.PrefetchScalarGridSpec(
            num_scalar_prefetch=1,
            grid=(n_t,),
            in_specs=[
                pl.BlockSpec((B, 1), lambda i, sched: (0, 0)),   # olens
                pl.BlockSpec((B, CH), t_map),                    # after (flattened)
                pl.BlockSpec((B, CH), t_map),                    # before (flattened)
                pl.BlockSpec((B, CH), t_map),                    # ys (flattened)
                pl.BlockSpec((B, tl), t_map),                    # stop logits
                pl.BlockSpec((B, tl), t_map),                    # stop labels
            ],
            out_specs=[
                pl.BlockSpec((B, 1), lambda i, sched: (0, 0)),
                pl.BlockSpec((B, 1), lambda i, sched: (0, 0)),
                pl.BlockSpec((B, 1), lambda i, sched: (0, 0)),
            ],
        ),
        compiler_params=pltpu.CompilerParams(
            dimension_semantics=("arbitrary",),
            vmem_limit_bytes=_VMEM_LIMIT),
    )(sched, olens2, after_f, before_f, ys_f, logits2, labels2)


# --------------------------------------------------------------------------
# Kernel 2: masked token-level cross entropy for the aux decoders
#           (vocab-tiled online logsumexp, src+trg streams fused)
# --------------------------------------------------------------------------
def _make_ce_kernel(n_streams, ts, tv):
    def kernel(*refs):
        sched_ref = refs[0]
        lens_refs = refs[1:1 + n_streams]
        lg_refs = refs[1 + n_streams:1 + 2 * n_streams]
        tg_refs = refs[1 + 2 * n_streams:1 + 3 * n_streams]
        ce_refs = refs[1 + 3 * n_streams:1 + 4 * n_streams]
        scratch = refs[1 + 4 * n_streams:]

        ti = pl.program_id(0)
        vi = pl.program_id(1)
        n_v = pl.num_programs(1)
        valid = ti * ts < sched_ref[0]

        @pl.when(jnp.logical_and(ti == 0, vi == 0))
        def _():
            for ce_ref in ce_refs:
                ce_ref[...] = jnp.zeros_like(ce_ref)

        @pl.when(jnp.logical_and(valid, vi == 0))
        def _():
            for k in range(n_streams):
                m_sc, s_sc, p_sc = scratch[3 * k:3 * k + 3]
                m_sc[...] = jnp.full_like(m_sc, _NEG_BIG)
                s_sc[...] = jnp.zeros_like(s_sc)
                p_sc[...] = jnp.zeros_like(p_sc)

        @pl.when(valid)
        def _():
            for k in range(n_streams):
                m_sc, s_sc, p_sc = scratch[3 * k:3 * k + 3]
                logits = lg_refs[k][...].astype(jnp.float32)          # (nb, ts, tv)
                nb = logits.shape[0]
                vidx = vi * tv + jax.lax.broadcasted_iota(jnp.int32, (nb, ts, tv), 2)
                onehot = (vidx == tg_refs[k][...]).astype(jnp.float32)
                p_sc[...] += jnp.sum(logits * onehot, axis=-1, keepdims=True)
                m_prev = m_sc[...]
                m_new = jnp.maximum(m_prev, jnp.max(logits, axis=-1, keepdims=True))
                s_sc[...] = (s_sc[...] * jnp.exp(m_prev - m_new)
                             + jnp.sum(jnp.exp(logits - m_new), axis=-1, keepdims=True))
                m_sc[...] = m_new

        @pl.when(jnp.logical_and(valid, vi == n_v - 1))
        def _():
            for k in range(n_streams):
                m_sc, s_sc, p_sc = scratch[3 * k:3 * k + 3]
                nb = m_sc.shape[0]
                t3 = ti * ts + jax.lax.broadcasted_iota(jnp.int32, (nb, ts, 1), 1)
                mask = t3 < lens_refs[k][...]                         # (nb, ts, 1)
                lse = m_sc[...] + jnp.log(s_sc[...])
                ce = jnp.where(mask, lse - p_sc[...], 0.0)
                ce_refs[k][...] += jnp.sum(ce, axis=1)                # (nb, 1)

    return kernel


def ce_partial_sums(lens_list, logits_list, targets_list):
    """Masked cross-entropy partial sums for one or more identically shaped
    (B, S, V) logits streams, fused into a single pallas_call."""
    n = len(logits_list)
    nb, S, V = logits_list[0].shape
    for lg in logits_list:
        assert lg.shape == (nb, S, V)
    isz = jnp.dtype(logits_list[0].dtype).itemsize

    # time tile
    TS_CAP = 256
    if S <= TS_CAP:
        ts, S_pad = S, S
    else:
        ts = TS_CAP
        S_pad = ((S + ts - 1) // ts) * ts

    # vocab tile (online logsumexp across the V grid axis)
    budget = (_VMEM_LIMIT * 5) // 8
    tv_cap = _round_down_mult(budget // max(2 * n * nb * ts * isz, 1), 128)
    if V <= tv_cap:
        tv, V_pad = V, V
    else:
        tv = tv_cap
        V_pad = ((V + tv - 1) // tv) * tv

    lg_args, tg_args, ln_args = [], [], []
    maxlen = None
    for lens, lg, tg in zip(lens_list, logits_list, targets_list):
        tg = tg.astype(jnp.int32)
        if S_pad != S:
            lg = jnp.pad(lg, ((0, 0), (0, S_pad - S), (0, 0)))
            tg = jnp.pad(tg, ((0, 0), (0, S_pad - S)))
        if V_pad != V:
            lg = jnp.pad(lg, ((0, 0), (0, 0), (0, V_pad - V)),
                         constant_values=_NEG_BIG)
        lg_args.append(lg)
        tg_args.append(tg.reshape(nb, S_pad, 1))
        ln_args.append(lens.astype(jnp.int32).reshape(nb, 1, 1))
        m = jnp.max(lens).astype(jnp.int32)
        maxlen = m if maxlen is None else jnp.maximum(maxlen, m)

    last_blk = jnp.maximum((maxlen + ts - 1) // ts - 1, 0).astype(jnp.int32)
    sched = jnp.stack([maxlen, last_blk])

    grid = (S_pad // ts, V_pad // tv)

    def lg_map(ti, vi, sched):
        return (0, jnp.minimum(ti, sched[1]), vi)

    def tg_map(ti, vi, sched):
        return (0, jnp.minimum(ti, sched[1]), 0)

    in_specs = ([pl.BlockSpec((nb, 1, 1), lambda ti, vi, sched: (0, 0, 0))] * n
                + [pl.BlockSpec((nb, ts, tv), lg_map)] * n
                + [pl.BlockSpec((nb, ts, 1), tg_map)] * n)
    out_specs = [pl.BlockSpec((nb, 1), lambda ti, vi, sched: (0, 0))] * n
    out_shape = tuple(jax.ShapeDtypeStruct((nb, 1), jnp.float32) for _ in range(n))

    res = pl.pallas_call(
        _make_ce_kernel(n, ts, tv),
        out_shape=out_shape,
        grid_spec=pltpu.PrefetchScalarGridSpec(
            num_scalar_prefetch=1,
            grid=grid,
            in_specs=in_specs,
            out_specs=out_specs,
            scratch_shapes=[pltpu.VMEM((nb, ts, 1), jnp.float32)] * (3 * n),
        ),
        compiler_params=pltpu.CompilerParams(
            dimension_semantics=("arbitrary", "arbitrary"),
            vmem_limit_bytes=_VMEM_LIMIT),
    )(sched, *ln_args, *lg_args, *tg_args)
    if not isinstance(res, (tuple, list)):
        res = (res,)
    return list(res)


# --------------------------------------------------------------------------
# TranslacotronLoss.forward (use_masking=True, use_cbhg=False,
# use_srcaux_decoder=True, use_trgaux_decoder=True)
# --------------------------------------------------------------------------
@functools.partial(jax.jit, static_argnames=("reduction_factor", "bce_pos_weight"))
def translacotron_loss(after_outs, before_outs, logits, ys, labels, olens,
                       src_logits, src_seq, src_seq_len,
                       trg_logits, trg_seq, trg_seq_len,
                       *, reduction_factor=1, bce_pos_weight=1.0):
    # reduction-factor adjustment: truncating ys/labels to max(olens) is a no-op
    # under the non-pad mask, so only olens needs adjusting.
    olens = olens - olens % reduction_factor
    D = ys.shape[-1]

    l1_acc, mse_acc, bce_acc = spec_bce_partial_sums(
        olens, after_outs, before_outs, ys, logits, labels,
        bce_pos_weight=bce_pos_weight)

    nt = jnp.sum(olens).astype(jnp.float32)
    nf = nt * D
    l1_loss = jnp.sum(l1_acc) / nf
    mse_loss = jnp.sum(mse_acc) / nf
    bce_loss = jnp.sum(bce_acc) / nt

    # aux decoders: targets are src_seq[:, 1:], trg_seq[:, 1:]; the two streams
    # are fused into one pallas_call when their shapes match.
    src_tgt, trg_tgt = src_seq[:, 1:], trg_seq[:, 1:]
    if src_logits.shape == trg_logits.shape:
        ce_src, ce_trg = ce_partial_sums(
            [src_seq_len, trg_seq_len], [src_logits, trg_logits], [src_tgt, trg_tgt])
    else:
        (ce_src,) = ce_partial_sums([src_seq_len], [src_logits], [src_tgt])
        (ce_trg,) = ce_partial_sums([trg_seq_len], [trg_logits], [trg_tgt])
    src_loss = jnp.sum(ce_src) / jnp.sum(src_seq_len).astype(jnp.float32)
    trg_loss = jnp.sum(ce_trg) / jnp.sum(trg_seq_len).astype(jnp.float32)

    total = l1_loss + mse_loss + bce_loss + src_loss + trg_loss
    return total, dict(l1_loss=l1_loss, mse_loss=mse_loss, bce_loss=bce_loss,
                       src_loss=src_loss, trg_loss=trg_loss)


# --------------------------------------------------------------------------
# Pure-JAX reference (mirrors the PyTorch masked_select / mean semantics)
# --------------------------------------------------------------------------
def reference_loss(after, before, logits, ys, labels, olens,
                   src_logits, src_seq, src_len, trg_logits, trg_seq, trg_len,
                   reduction_factor=1, bce_pos_weight=1.0):
    olens = olens - olens % reduction_factor
    B, L, D = ys.shape
    m2 = (jnp.arange(L)[None, :] < olens[:, None]).astype(jnp.float32)
    m3 = m2[:, :, None]
    nt = jnp.sum(olens).astype(jnp.float32)
    nf = nt * D
    l1 = (jnp.sum(jnp.abs(after - ys) * m3) + jnp.sum(jnp.abs(before - ys) * m3)) / nf
    mse = (jnp.sum((after - ys) ** 2 * m3) + jnp.sum((before - ys) ** 2 * m3)) / nf
    bce_e = (jnp.maximum(logits, 0.0) - logits * labels
             + jnp.log1p(jnp.exp(-jnp.abs(logits))))
    if bce_pos_weight != 1.0:
        bce_e = bce_e * (1.0 + (bce_pos_weight - 1.0) * labels)
    bce = jnp.sum(bce_e * m2) / nt

    def ce(lg, tg, ln):
        S = lg.shape[1]
        mm = (jnp.arange(S)[None, :] < ln[:, None]).astype(jnp.float32)
        lse = jax.scipy.special.logsumexp(lg, axis=-1)
        pick = jnp.take_along_axis(lg, tg[:, :, None], axis=-1)[:, :, 0]
        return jnp.sum((lse - pick) * mm) / jnp.sum(ln).astype(jnp.float32)

    return (l1 + mse + bce
            + ce(src_logits, src_seq[:, 1:], src_len)
            + ce(trg_logits, trg_seq[:, 1:], trg_len))


if __name__ == "__main__":
    B, Lmax, odim = 2, 16, 16      # spectrogram targets (B, Lmax, odim)
    S, V = 16, 32                  # aux decoder length / vocab

    key = jax.random.PRNGKey(0)
    keys = jax.random.split(key, 10)

    # model outputs (stand-ins for the external Translacotron model)
    after_outs = jax.random.normal(keys[0], (B, Lmax, odim), jnp.float32)
    before_outs = jax.random.normal(keys[1], (B, Lmax, odim), jnp.float32)
    logits = jax.random.normal(keys[2], (B, Lmax), jnp.float32)
    src_logits = jax.random.normal(keys[3], (B, S, V), jnp.float32)
    trg_logits = jax.random.normal(keys[4], (B, S, V), jnp.float32)

    # targets
    ys = jax.random.normal(keys[5], (B, Lmax, odim), jnp.float32)
    olens = jnp.array([16, 10], dtype=jnp.int32)
    labels = (jnp.arange(Lmax)[None, :] == (olens[:, None] - 1)).astype(jnp.float32)

    src_seq = jax.random.randint(keys[6], (B, S + 1), 1, V, dtype=jnp.int32)
    trg_seq = jax.random.randint(keys[7], (B, S + 1), 1, V, dtype=jnp.int32)
    src_seq_len = jnp.array([16, 12], dtype=jnp.int32)
    trg_seq_len = jnp.array([16, 9], dtype=jnp.int32)

    total, parts = translacotron_loss(
        after_outs, before_outs, logits, ys, labels, olens,
        src_logits, src_seq, src_seq_len,
        trg_logits, trg_seq, trg_seq_len,
        reduction_factor=1, bce_pos_weight=1.0)
    total = jax.block_until_ready(total)

    ref = reference_loss(after_outs, before_outs, logits, ys, labels, olens,
                         src_logits, src_seq, src_seq_len,
                         trg_logits, trg_seq, trg_seq_len)
    assert jnp.allclose(total, ref, rtol=1e-4, atol=1e-4), (total, ref)
    print("KERNEL_OK")
</pallas_src>

<mosaic_0001>
module attributes {stable_mosaic.version = 11 : i64} {
  func.func @kernel(%arg0: i32, %arg1: i32, %arg2: memref<2xi32, #tpu.memory_space<smem>>, %arg3: memref<2x1x1xi32, #tpu.memory_space<vmem>>, %arg4: memref<2x1x1xi32, #tpu.memory_space<vmem>>, %arg5: memref<2x16x32xf32, #tpu.memory_space<vmem>>, %arg6: memref<2x16x32xf32, #tpu.memory_space<vmem>>, %arg7: memref<2x16x1xi32, #tpu.memory_space<vmem>>, %arg8: memref<2x16x1xi32, #tpu.memory_space<vmem>>, %arg9: memref<2x1xf32, #tpu.memory_space<vmem>>, %arg10: memref<2x1xf32, #tpu.memory_space<vmem>>, %arg11: memref<2x16x1xf32, #tpu.memory_space<vmem>>, %arg12: memref<2x16x1xf32, #tpu.memory_space<vmem>>, %arg13: memref<2x16x1xf32, #tpu.memory_space<vmem>>, %arg14: memref<2x16x1xf32, #tpu.memory_space<vmem>>, %arg15: memref<2x16x1xf32, #tpu.memory_space<vmem>>, %arg16: memref<2x16x1xf32, #tpu.memory_space<vmem>>) attributes {dimension_semantics = [#tpu.dimension_semantics<arbitrary>, #tpu.dimension_semantics<arbitrary>], iteration_bounds = array<i64: 1, 1>, scalar_prefetch = 1 : i64, scratch_operands = 6 : i64, tpu.core_type = #tpu.core_type<tc>, window_params = [{pipeline_mode = #tpu.pipeline_mode<synchronous>, transform_indices = @transform_0, window_bounds = array<i64: 2, 1, 1>}, {pipeline_mode = #tpu.pipeline_mode<synchronous>, transform_indices = @transform_1, window_bounds = array<i64: 2, 1, 1>}, {transform_indices = @transform_2, window_bounds = array<i64: 2, 16, 32>}, {transform_indices = @transform_3, window_bounds = array<i64: 2, 16, 32>}, {transform_indices = @transform_4, window_bounds = array<i64: 2, 16, 1>}, {transform_indices = @transform_5, window_bounds = array<i64: 2, 16, 1>}, {pipeline_mode = #tpu.pipeline_mode<synchronous>, transform_indices = @transform_6, window_bounds = array<i64: 2, 1>}, {pipeline_mode = #tpu.pipeline_mode<synchronous>, transform_indices = @transform_7, window_bounds = array<i64: 2, 1>}]} {
    %c16_i32 = arith.constant 16 : i32
    %0 = arith.muli %arg0, %c16_i32 : i32
    %c0 = arith.constant 0 : index
    %1 = memref.load %arg2[%c0] : memref<2xi32, #tpu.memory_space<smem>>
    %2 = arith.cmpi slt, %0, %1 : i32
    %c0_i32 = arith.constant 0 : i32
    %3 = arith.cmpi eq, %arg0, %c0_i32 : i32
    %c0_i32_0 = arith.constant 0 : i32
    %4 = arith.cmpi eq, %arg1, %c0_i32_0 : i32
    %5 = arith.andi %3, %4 : i1
    %6 = arith.extui %5 : i1 to i32
    %c0_i32_1 = arith.constant 0 : i32
    %7 = arith.cmpi ne, %6, %c0_i32_1 : i32
    scf.if %7 {
      %cst = arith.constant 0.000000e+00 : f32
      %18 = vector.broadcast %cst : f32 to vector<2x1xf32>
      %c0_7 = arith.constant 0 : index
      %c0_8 = arith.constant 0 : index
      %19 = vector.load %arg9[%c0_7, %c0_8] : memref<2x1xf32, #tpu.memory_space<vmem>>, vector<2x1xf32>
      tpu.vector_store %arg9[%c0_7, %c0_8], %18 {strides = array<i32>} : memref<2x1xf32, #tpu.memory_space<vmem>>, vector<2x1xf32>,
      %cst_9 = arith.constant 0.000000e+00 : f32
      %20 = vector.broadcast %cst_9 : f32 to vector<2x1xf32>
      %c0_10 = arith.constant 0 : index
      %c0_11 = arith.constant 0 : index
      %21 = vector.load %arg10[%c0_10, %c0_11] : memref<2x1xf32, #tpu.memory_space<vmem>>, vector<2x1xf32>
      tpu.vector_store %arg10[%c0_10, %c0_11], %20 {strides = array<i32>} : memref<2x1xf32, #tpu.memory_space<vmem>>, vector<2x1xf32>,
    } else {
    }
    %c0_i32_2 = arith.constant 0 : i32
    %8 = arith.cmpi eq, %arg1, %c0_i32_2 : i32
    %9 = arith.andi %2, %8 : i1
    %10 = arith.extui %9 : i1 to i32
    %c0_i32_3 = arith.constant 0 : i32
    %11 = arith.cmpi ne, %10, %c0_i32_3 : i32
    scf.if %11 {
      %cst = arith.constant -1.000000e+30 : f32
      %18 = vector.broadcast %cst : f32 to vector<2x16x1xf32>
      %c0_7 = arith.constant 0 : index
      %c0_8 = arith.constant 0 : index
      %c0_9 = arith.constant 0 : index
      %19 = vector.load %arg11[%c0_7, %c0_8, %c0_9] : memref<2x16x1xf32, #tpu.memory_space<vmem>>, vector<2x16x1xf32>
      tpu.vector_store %arg11[%c0_7, %c0_8, %c0_9], %18 {strides = array<i32>} : memref<2x16x1xf32, #tpu.memory_space<vmem>>, vector<2x16x1xf32>,
      %cst_10 = arith.constant 0.000000e+00 : f32
      %20 = vector.broadcast %cst_10 : f32 to vector<2x16x1xf32>
      %c0_11 = arith.constant 0 : index
      %c0_12 = arith.constant 0 : index
      %c0_13 = arith.constant 0 : index
      %21 = vector.load %arg12[%c0_11, %c0_12, %c0_13] : memref<2x16x1xf32, #tpu.memory_space<vmem>>, vector<2x16x1xf32>
      tpu.vector_store %arg12[%c0_11, %c0_12, %c0_13], %20 {strides = array<i32>} : memref<2x16x1xf32, #tpu.memory_space<vmem>>, vector<2x16x1xf32>,
      %cst_14 = arith.constant 0.000000e+00 : f32
      %22 = vector.broadcast %cst_14 : f32 to vector<2x16x1xf32>
      %c0_15 = arith.constant 0 : index
      %c0_16 = arith.constant 0 : index
      %c0_17 = arith.constant 0 : index
      %23 = vector.load %arg13[%c0_15, %c0_16, %c0_17] : memref<2x16x1xf32, #tpu.memory_space<vmem>>, vector<2x16x1xf32>
      tpu.vector_store %arg13[%c0_15, %c0_16, %c0_17], %22 {strides = array<i32>} : memref<2x16x1xf32, #tpu.memory_space<vmem>>, vector<2x16x1xf32>,
      %cst_18 = arith.constant -1.000000e+30 : f32
      %24 = vector.broadcast %cst_18 : f32 to vector<2x16x1xf32>
      %c0_19 = arith.constant 0 : index
      %c0_20 = arith.constant 0 : index
      %c0_21 = arith.constant 0 : index
      %25 = vector.load %arg14[%c0_19, %c0_20, %c0_21] : memref<2x16x1xf32, #tpu.memory_space<vmem>>, vector<2x16x1xf32>
      tpu.vector_store %arg14[%c0_19, %c0_20, %c0_21], %24 {strides = array<i32>} : memref<2x16x1xf32, #tpu.memory_space<vmem>>, vector<2x16x1xf32>,
      %cst_22 = arith.constant 0.000000e+00 : f32
      %26 = vector.broadcast %cst_22 : f32 to vector<2x16x1xf32>
      %c0_23 = arith.constant 0 : index
      %c0_24 = arith.constant 0 : index
      %c0_25 = arith.constant 0 : index
      %27 = vector.load %arg15[%c0_23, %c0_24, %c0_25] : memref<2x16x1xf32, #tpu.memory_space<vmem>>, vector<2x16x1xf32>
      tpu.vector_store %arg15[%c0_23, %c0_24, %c0_25], %26 {strides = array<i32>} : memref<2x16x1xf32, #tpu.memory_space<vmem>>, vector<2x16x1xf32>,
      %cst_26 = arith.constant 0.000000e+00 : f32
      %28 = vector.broadcast %cst_26 : f32 to vector<2x16x1xf32>
      %c0_27 = arith.constant 0 : index
      %c0_28 = arith.constant 0 : index
      %c0_29 = arith.constant 0 : index
      %29 = vector.load %arg16[%c0_27, %c0_28, %c0_29] : memref<2x16x1xf32, #tpu.memory_space<vmem>>, vector<2x16x1xf32>
      tpu.vector_store %arg16[%c0_27, %c0_28, %c0_29], %28 {strides = array<i32>} : memref<2x16x1xf32, #tpu.memory_space<vmem>>, vector<2x16x1xf32>,
    } else {
    }
    %12 = arith.extui %2 : i1 to i32
    %c0_i32_4 = arith.constant 0 : i32
    %13 = arith.cmpi ne, %12, %c0_i32_4 : i32
    scf.if %13 {
      %c0_7 = arith.constant 0 : index
      %c0_8 = arith.constant 0 : index
      %c0_9 = arith.constant 0 : index
      %18 = vector.load %arg5[%c0_7, %c0_8, %c0_9] : memref<2x16x32xf32, #tpu.memory_space<vmem>>, vector<2x16x32xf32>
      %c32_i32 = arith.constant 32 : i32
      %19 = arith.muli %arg1, %c32_i32 : i32
      %20 = tpu.iota {dimensions = array<i32: 2>} : vector<2x16x32xi32>
      %21 = vector.broadcast %19 : i32 to vector<2x16x32xi32>
      %22 = arith.addi %21, %20 : vector<2x16x32xi32>
      %c0_10 = arith.constant 0 : index
      %c0_11 = arith.constant 0 : index
      %c0_12 = arith.constant 0 : index
      %23 = vector.load %arg7[%c0_10, %c0_11, %c0_12] : memref<2x16x1xi32, #tpu.memory_space<vmem>>, vector<2x16x1xi32>
      %24 = vector.broadcast %23 : vector<2x16x1xi32> to vector<2x16x32xi32>
      %25 = arith.cmpi eq, %22, %24 : vector<2x16x32xi32>
      %26 = arith.extui %25 : vector<2x16x32xi1> to vector<2x16x32xi32>
      %27 = arith.sitofp %26 : vector<2x16x32xi32> to vector<2x16x32xf32>
      %c0_13 = arith.constant 0 : index
      %c0_14 = arith.constant 0 : index
      %c0_15 = arith.constant 0 : index
      %28 = vector.load %arg13[%c0_13, %c0_14, %c0_15] : memref<2x16x1xf32, #tpu.memory_space<vmem>>, vector<2x16x1xf32>
      %29 = arith.mulf %18, %27 : vector<2x16x32xf32>
      %cst = arith.constant dense<0.000000e+00> : vector<2x16xf32>
      %30 = vector.multi_reduction <add>, %29, %cst [2] : vector<2x16x32xf32> to vector<2x16xf32>
      %31 = vector.shape_cast %30 : vector<2x16xf32> to vector<2x16x1xf32>
      %32 = arith.addf %28, %31 : vector<2x16x1xf32>
      %c0_16 = arith.constant 0 : index
      %c0_17 = arith.constant 0 : index
      %c0_18 = arith.constant 0 : index
      %33 = vector.load %arg13[%c0_16, %c0_17, %c0_18] : memref<2x16x1xf32, #tpu.memory_space<vmem>>, vector<2x16x1xf32>
      tpu.vector_store %arg13[%c0_16, %c0_17, %c0_18], %32 {strides = array<i32>} : memref<2x16x1xf32, #tpu.memory_space<vmem>>, vector<2x16x1xf32>,
      %c0_19 = arith.constant 0 : index
      %c0_20 = arith.constant 0 : index
      %c0_21 = arith.constant 0 : index
      %34 = vector.load %arg11[%c0_19, %c0_20, %c0_21] : memref<2x16x1xf32, #tpu.memory_space<vmem>>, vector<2x16x1xf32>
      %cst_22 = arith.constant dense<0xFF800000> : vector<2x16xf32>
      %35 = vector.multi_reduction <maximumf>, %18, %cst_22 [2] : vector<2x16x32xf32> to vector<2x16xf32>
      %36 = vector.shape_cast %35 : vector<2x16xf32> to vector<2x16x1xf32>
      %37 = arith.maximumf %34, %36 : vector<2x16x1xf32>
      %c0_23 = arith.constant 0 : index
      %c0_24 = arith.constant 0 : index
      %c0_25 = arith.constant 0 : index
      %38 = vector.load %arg12[%c0_23, %c0_24, %c0_25] : memref<2x16x1xf32, #tpu.memory_space<vmem>>, vector<2x16x1xf32>
      %39 = arith.subf %34, %37 : vector<2x16x1xf32>
      %40 = math.exp %39 : vector<2x16x1xf32>
      %41 = arith.mulf %38, %40 : vector<2x16x1xf32>
      %42 = vector.broadcast %37 : vector<2x16x1xf32> to vector<2x16x32xf32>
      %43 = arith.subf %18, %42 : vector<2x16x32xf32>
      %44 = math.exp %43 : vector<2x16x32xf32>
      %cst_26 = arith.constant dense<0.000000e+00> : vector<2x16xf32>
      %45 = vector.multi_reduction <add>, %44, %cst_26 [2] : vector<2x16x32xf32> to vector<2x16xf32>
      %46 = vector.shape_cast %45 : vector<2x16xf32> to vector<2x16x1xf32>
      %47 = arith.addf %41, %46 : vector<2x16x1xf32>
      %c0_27 = arith.constant 0 : index
      %c0_28 = arith.constant 0 : index
      %c0_29 = arith.constant 0 : index
      %48 = vector.load %arg12[%c0_27, %c0_28, %c0_29] : memref<2x16x1xf32, #tpu.memory_space<vmem>>, vector<2x16x1xf32>
      tpu.vector_store %arg12[%c0_27, %c0_28, %c0_29], %47 {strides = array<i32>} : memref<2x16x1xf32, #tpu.memory_space<vmem>>, vector<2x16x1xf32>,
      %c0_30 = arith.constant 0 : index
      %c0_31 = arith.constant 0 : index
      %c0_32 = arith.constant 0 : index
      %49 = vector.load %arg11[%c0_30, %c0_31, %c0_32] : memref<2x16x1xf32, #tpu.memory_space<vmem>>, vector<2x16x1xf32>
      tpu.vector_store %arg11[%c0_30, %c0_31, %c0_32], %37 {strides = array<i32>} : memref<2x16x1xf32, #tpu.memory_space<vmem>>, vector<2x16x1xf32>,
      %c0_33 = arith.constant 0 : index
      %c0_34 = arith.constant 0 : index
      %c0_35 = arith.constant 0 : index
      %50 = vector.load %arg6[%c0_33, %c0_34, %c0_35] : memref<2x16x32xf32, #tpu.memory_space<vmem>>, vector<2x16x32xf32>
      %c32_i32_36 = arith.constant 32 : i32
      %51 = arith.muli %arg1, %c32_i32_36 : i32
      %52 = tpu.iota {dimensions = array<i32: 2>} : vector<2x16x32xi32>
      %53 = vector.broadcast %51 : i32 to vector<2x16x32xi32>
      %54 = arith.addi %53, %52 : vector<2x16x32xi32>
      %c0_37 = arith.constant 0 : index
      %c0_38 = arith.constant 0 : index
      %c0_39 = arith.constant 0 : index
      %55 = vector.load %arg8[%c0_37, %c0_38, %c0_39] : memref<2x16x1xi32, #tpu.memory_space<vmem>>, vector<2x16x1xi32>
      %56 = vector.broadcast %55 : vector<2x16x1xi32> to vector<2x16x32xi32>
      %57 = arith.cmpi eq, %54, %56 : vector<2x16x32xi32>
      %58 = arith.extui %57 : vector<2x16x32xi1> to vector<2x16x32xi32>
      %59 = arith.sitofp %58 : vector<2x16x32xi32> to vector<2x16x32xf32>
      %c0_40 = arith.constant 0 : index
      %c0_41 = arith.constant 0 : index
      %c0_42 = arith.constant 0 : index
      %60 = vector.load %arg16[%c0_40, %c0_41, %c0_42] : memref<2x16x1xf32, #tpu.memory_space<vmem>>, vector<2x16x1xf32>
      %61 = arith.mulf %50, %59 : vector<2x16x32xf32>
      %cst_43 = arith.constant dense<0.000000e+00> : vector<2x16xf32>
      %62 = vector.multi_reduction <add>, %61, %cst_43 [2] : vector<2x16x32xf32> to vector<2x16xf32>
      %63 = vector.shape_cast %62 : vector<2x16xf32> to vector<2x16x1xf32>
      %64 = arith.addf %60, %63 : vector<2x16x1xf32>
      %c0_44 = arith.constant 0 : index
      %c0_45 = arith.constant 0 : index
      %c0_46 = arith.constant 0 : index
      %65 = vector.load %arg16[%c0_44, %c0_45, %c0_46] : memref<2x16x1xf32, #tpu.memory_space<vmem>>, vector<2x16x1xf32>
      tpu.vector_store %arg16[%c0_44, %c0_45, %c0_46], %64 {strides = array<i32>} : memref<2x16x1xf32, #tpu.memory_space<vmem>>, vector<2x16x1xf32>,
      %c0_47 = arith.constant 0 : index
      %c0_48 = arith.constant 0 : index
      %c0_49 = arith.constant 0 : index
      %66 = vector.load %arg14[%c0_47, %c0_48, %c0_49] : memref<2x16x1xf32, #tpu.memory_space<vmem>>, vector<2x16x1xf32>
      %cst_50 = arith.constant dense<0xFF800000> : vector<2x16xf32>
      %67 = vector.multi_reduction <maximumf>, %50, %cst_50 [2] : vector<2x16x32xf32> to vector<2x16xf32>
      %68 = vector.shape_cast %67 : vector<2x16xf32> to vector<2x16x1xf32>
      %69 = arith.maximumf %66, %68 : vector<2x16x1xf32>
      %c0_51 = arith.constant 0 : index
      %c0_52 = arith.constant 0 : index
      %c0_53 = arith.constant 0 : index
      %70 = vector.load %arg15[%c0_51, %c0_52, %c0_53] : memref<2x16x1xf32, #tpu.memory_space<vmem>>, vector<2x16x1xf32>
      %71 = arith.subf %66, %69 : vector<2x16x1xf32>
      %72 = math.exp %71 : vector<2x16x1xf32>
      %73 = arith.mulf %70, %72 : vector<2x16x1xf32>
      %74 = vector.broadcast %69 : vector<2x16x1xf32> to vector<2x16x32xf32>
      %75 = arith.subf %50, %74 : vector<2x16x32xf32>
      %76 = math.exp %75 : vector<2x16x32xf32>
      %cst_54 = arith.constant dense<0.000000e+00> : vector<2x16xf32>
      %77 = vector.multi_reduction <add>, %76, %cst_54 [2] : vector<2x16x32xf32> to vector<2x16xf32>
      %78 = vector.shape_cast %77 : vector<2x16xf32> to vector<2x16x1xf32>
      %79 = arith.addf %73, %78 : vector<2x16x1xf32>
      %c0_55 = arith.constant 0 : index
      %c0_56 = arith.constant 0 : index
      %c0_57 = arith.constant 0 : index
      %80 = vector.load %arg15[%c0_55, %c0_56, %c0_57] : memref<2x16x1xf32, #tpu.memory_space<vmem>>, vector<2x16x1xf32>
      tpu.vector_store %arg15[%c0_55, %c0_56, %c0_57], %79 {strides = array<i32>} : memref<2x16x1xf32, #tpu.memory_space<vmem>>, vector<2x16x1xf32>,
      %c0_58 = arith.constant 0 : index
      %c0_59 = arith.constant 0 : index
      %c0_60 = arith.constant 0 : index
      %81 = vector.load %arg14[%c0_58, %c0_59, %c0_60] : memref<2x16x1xf32, #tpu.memory_space<vmem>>, vector<2x16x1xf32>
      tpu.vector_store %arg14[%c0_58, %c0_59, %c0_60], %69 {strides = array<i32>} : memref<2x16x1xf32, #tpu.memory_space<vmem>>, vector<2x16x1xf32>,
    } else {
    }
    %c0_i32_5 = arith.constant 0 : i32
    %14 = arith.cmpi eq, %arg1, %c0_i32_5 : i32
    %15 = arith.andi %2, %14 : i1
    %16 = arith.extui %15 : i1 to i32
    %c0_i32_6 = arith.constant 0 : i32
    %17 = arith.cmpi ne, %16, %c0_i32_6 : i32
    scf.if %17 {
      %c16_i32_7 = arith.constant 16 : i32
      %18 = arith.muli %arg0, %c16_i32_7 : i32
      %19 = tpu.iota {dimensions = array<i32: 1>} : vector<2x16x1xi32>
      %20 = vector.broadcast %18 : i32 to vector<2x16x1xi32>
      %21 = arith.addi %20, %19 : vector<2x16x1xi32>
      %c0_8 = arith.constant 0 : index
      %c0_9 = arith.constant 0 : index
      %c0_10 = arith.constant 0 : index
      %22 = vector.load %arg3[%c0_8, %c0_9, %c0_10] : memref<2x1x1xi32, #tpu.memory_space<vmem>>, vector<2x1x1xi32>
      %23 = vector.broadcast %22 : vector<2x1x1xi32> to vector<2x16x1xi32>
      %24 = arith.cmpi slt, %21, %23 : vector<2x16x1xi32>
      %c0_11 = arith.constant 0 : index
      %c0_12 = arith.constant 0 : index
      %c0_13 = arith.constant 0 : index
      %25 = vector.load %arg11[%c0_11, %c0_12, %c0_13] : memref<2x16x1xf32, #tpu.memory_space<vmem>>, vector<2x16x1xf32>
      %c0_14 = arith.constant 0 : index
      %c0_15 = arith.constant 0 : index
      %c0_16 = arith.constant 0 : index
      %26 = vector.load %arg12[%c0_14, %c0_15, %c0_16] : memref<2x16x1xf32, #tpu.memory_space<vmem>>, vector<2x16x1xf32>
      %27 = math.log %26 : vector<2x16x1xf32>
      %28 = arith.addf %25, %27 : vector<2x16x1xf32>
      %c0_17 = arith.constant 0 : index
      %c0_18 = arith.constant 0 : index
      %c0_19 = arith.constant 0 : index
      %29 = vector.load %arg13[%c0_17, %c0_18, %c0_19] : memref<2x16x1xf32, #tpu.memory_space<vmem>>, vector<2x16x1xf32>
      %30 = arith.subf %28, %29 : vector<2x16x1xf32>
      %cst = arith.constant 0.000000e+00 : f32
      %31 = vector.broadcast %cst : f32 to vector<2x16x1xf32>
      %32 = arith.select %24, %30, %31 : vector<2x16x1xi1>, vector<2x16x1xf32>
      %c0_20 = arith.constant 0 : index
      %c0_21 = arith.constant 0 : index
      %33 = vector.load %arg9[%c0_20, %c0_21] : memref<2x1xf32, #tpu.memory_space<vmem>>, vector<2x1xf32>
      %cst_22 = arith.constant dense<0.000000e+00> : vector<2x1xf32>
      %34 = vector.multi_reduction <add>, %32, %cst_22 [1] : vector<2x16x1xf32> to vector<2x1xf32>
      %35 = arith.addf %33, %34 : vector<2x1xf32>
      %c0_23 = arith.constant 0 : index
      %c0_24 = arith.constant 0 : index
      %36 = vector.load %arg9[%c0_23, %c0_24] : memref<2x1xf32, #tpu.memory_space<vmem>>, vector<2x1xf32>
      tpu.vector_store %arg9[%c0_23, %c0_24], %35 {strides = array<i32>} : memref<2x1xf32, #tpu.memory_space<vmem>>, vector<2x1xf32>,
      %c16_i32_25 = arith.constant 16 : i32
      %37 = arith.muli %arg0, %c16_i32_25 : i32
      %38 = tpu.iota {dimensions = array<i32: 1>} : vector<2x16x1xi32>
      %39 = vector.broadcast %37 : i32 to vector<2x16x1xi32>
      %40 = arith.addi %39, %38 : vector<2x16x1xi32>
      %c0_26 = arith.constant 0 : index
      %c0_27 = arith.constant 0 : index
      %c0_28 = arith.constant 0 : index
      %41 = vector.load %arg4[%c0_26, %c0_27, %c0_28] : memref<2x1x1xi32, #tpu.memory_space<vmem>>, vector<2x1x1xi32>
      %42 = vector.broadcast %41 : vector<2x1x1xi32> to vector<2x16x1xi32>
      %43 = arith.cmpi slt, %40, %42 : vector<2x16x1xi32>
      %c0_29 = arith.constant 0 : index
      %c0_30 = arith.constant 0 : index
      %c0_31 = arith.constant 0 : index
      %44 = vector.load %arg14[%c0_29, %c0_30, %c0_31] : memref<2x16x1xf32, #tpu.memory_space<vmem>>, vector<2x16x1xf32>
      %c0_32 = arith.constant 0 : index
      %c0_33 = arith.constant 0 : index
      %c0_34 = arith.constant 0 : index
      %45 = vector.load %arg15[%c0_32, %c0_33, %c0_34] : memref<2x16x1xf32, #tpu.memory_space<vmem>>, vector<2x16x1xf32>
      %46 = math.log %45 : vector<2x16x1xf32>
      %47 = arith.addf %44, %46 : vector<2x16x1xf32>
      %c0_35 = arith.constant 0 : index
      %c0_36 = arith.constant 0 : index
      %c0_37 = arith.constant 0 : index
      %48 = vector.load %arg16[%c0_35, %c0_36, %c0_37] : memref<2x16x1xf32, #tpu.memory_space<vmem>>, vector<2x16x1xf32>
      %49 = arith.subf %47, %48 : vector<2x16x1xf32>
      %cst_38 = arith.constant 0.000000e+00 : f32
      %50 = vector.broadcast %cst_38 : f32 to vector<2x16x1xf32>
      %51 = arith.select %43, %49, %50 : vector<2x16x1xi1>, vector<2x16x1xf32>
      %c0_39 = arith.constant 0 : index
      %c0_40 = arith.constant 0 : index
      %52 = vector.load %arg10[%c0_39, %c0_40] : memref<2x1xf32, #tpu.memory_space<vmem>>, vector<2x1xf32>
      %cst_41 = arith.constant dense<0.000000e+00> : vector<2x1xf32>
      %53 = vector.multi_reduction <add>, %51, %cst_41 [1] : vector<2x16x1xf32> to vector<2x1xf32>
      %54 = arith.addf %52, %53 : vector<2x1xf32>
      %c0_42 = arith.constant 0 : index
      %c0_43 = arith.constant 0 : index
      %55 = vector.load %arg10[%c0_42, %c0_43] : memref<2x1xf32, #tpu.memory_space<vmem>>, vector<2x1xf32>
      tpu.vector_store %arg10[%c0_42, %c0_43], %54 {strides = array<i32>} : memref<2x1xf32, #tpu.memory_space<vmem>>, vector<2x1xf32>,
    } else {
    }
    return
  }
  func.func @transform_0(%arg0: i32, %arg1: i32, %arg2: memref<2xi32, #tpu.memory_space<smem>>) -> (i32, i32, i32) {
    %c0_i32 = arith.constant 0 : i32
    %c0_i32_0 = arith.constant 0 : i32
    %c0_i32_1 = arith.constant 0 : i32
    %c0_i32_2 = arith.constant 0 : i32
    return %c0_i32, %c0_i32_0, %c0_i32_1 : i32, i32, i32
  }
  func.func @transform_1(%arg0: i32, %arg1: i32, %arg2: memref<2xi32, #tpu.memory_space<smem>>) -> (i32, i32, i32) {
    %c0_i32 = arith.constant 0 : i32
    %c0_i32_0 = arith.constant 0 : i32
    %c0_i32_1 = arith.constant 0 : i32
    %c0_i32_2 = arith.constant 0 : i32
    return %c0_i32, %c0_i32_0, %c0_i32_1 : i32, i32, i32
  }
  func.func @transform_2(%arg0: i32, %arg1: i32, %arg2: memref<2xi32, #tpu.memory_space<smem>>) -> (i32, i32, i32) {
    %c1 = arith.constant 1 : index
    %0 = memref.load %arg2[%c1] : memref<2xi32, #tpu.memory_space<smem>>
    %1 = arith.minsi %arg0, %0 : i32
    %c0_i32 = arith.constant 0 : i32
    %c0_i32_0 = arith.constant 0 : i32
    return %c0_i32, %1, %arg1 : i32, i32, i32
  }
  func.func @transform_3(%arg0: i32, %arg1: i32, %arg2: memref<2xi32, #tpu.memory_space<smem>>) -> (i32, i32, i32) {
    %c1 = arith.constant 1 : index
    %0 = memref.load %arg2[%c1] : memref<2xi32, #tpu.memory_space<smem>>
    %1 = arith.minsi %arg0, %0 : i32
    %c0_i32 = arith.constant 0 : i32
    %c0_i32_0 = arith.constant 0 : i32
    return %c0_i32, %1, %arg1 : i32, i32, i32
  }
  func.func @transform_4(%arg0: i32, %arg1: i32, %arg2: memref<2xi32, #tpu.memory_space<smem>>) -> (i32, i32, i32) {
    %c1 = arith.constant 1 : index
    %0 = memref.load %arg2[%c1] : memref<2xi32, #tpu.memory_space<smem>>
    %1 = arith.minsi %arg0, %0 : i32
    %c0_i32 = arith.constant 0 : i32
    %c0_i32_0 = arith.constant 0 : i32
    %c0_i32_1 = arith.constant 0 : i32
    return %c0_i32, %1, %c0_i32_0 : i32, i32, i32
  }
  func.func @transform_5(%arg0: i32, %arg1: i32, %arg2: memref<2xi32, #tpu.memory_space<smem>>) -> (i32, i32, i32) {
    %c1 = arith.constant 1 : index
    %0 = memref.load %arg2[%c1] : memref<2xi32, #tpu.memory_space<smem>>
    %1 = arith.minsi %arg0, %0 : i32
    %c0_i32 = arith.constant 0 : i32
    %c0_i32_0 = arith.constant 0 : i32
    %c0_i32_1 = arith.constant 0 : i32
    return %c0_i32, %1, %c0_i32_0 : i32, i32, i32
  }
  func.func @transform_6(%arg0: i32, %arg1: i32, %arg2: memref<2xi32, #tpu.memory_space<smem>>) -> (i32, i32) {
    %c0_i32 = arith.constant 0 : i32
    %c0_i32_0 = arith.constant 0 : i32
    %c0_i32_1 = arith.constant 0 : i32
    return %c0_i32, %c0_i32_0 : i32, i32
  }
  func.func @transform_7(%arg0: i32, %arg1: i32, %arg2: memref<2xi32, #tpu.memory_space<smem>>) -> (i32, i32) {
    %c0_i32 = arith.constant 0 : i32
    %c0_i32_0 = arith.constant 0 : i32
    %c0_i32_1 = arith.constant 0 : i32
    return %c0_i32, %c0_i32_0 : i32, i32
  }
}

module attributes {stable_mosaic.version = 11 : i64} {
  func.func @kernel(%arg0: i32, %arg1: memref<2xi32, #tpu.memory_space<smem>>, %arg2: memref<2x1xi32, #tpu.memory_space<vmem>>, %arg3: memref<2x256xf32, #tpu.memory_space<vmem>>, %arg4: memref<2x256xf32, #tpu.memory_space<vmem>>, %arg5: memref<2x256xf32, #tpu.memory_space<vmem>>, %arg6: memref<2x16xf32, #tpu.memory_space<vmem>>, %arg7: memref<2x16xf32, #tpu.memory_space<vmem>>, %arg8: memref<2x1xf32, #tpu.memory_space<vmem>>, %arg9: memref<2x1xf32, #tpu.memory_space<vmem>>, %arg10: memref<2x1xf32, #tpu.memory_space<vmem>>) attributes {dimension_semantics = [#tpu.dimension_semantics<arbitrary>], iteration_bounds = array<i64: 1>, scalar_prefetch = 1 : i64, scratch_operands = 0 : i64, tpu.core_type = #tpu.core_type<tc>, window_params = [{pipeline_mode = #tpu.pipeline_mode<synchronous>, transform_indices = @transform_0, window_bounds = array<i64: 2, 1>}, {transform_indices = @transform_1, window_bounds = array<i64: 2, 256>}, {transform_indices = @transform_2, window_bounds = array<i64: 2, 256>}, {transform_indices = @transform_3, window_bounds = array<i64: 2, 256>}, {transform_indices = @transform_4, window_bounds = array<i64: 2, 16>}, {transform_indices = @transform_5, window_bounds = array<i64: 2, 16>}, {pipeline_mode = #tpu.pipeline_mode<synchronous>, transform_indices = @transform_6, window_bounds = array<i64: 2, 1>}, {pipeline_mode = #tpu.pipeline_mode<synchronous>, transform_indices = @transform_7, window_bounds = array<i64: 2, 1>}, {pipeline_mode = #tpu.pipeline_mode<synchronous>, transform_indices = @transform_8, window_bounds = array<i64: 2, 1>}]} {
    %c0_i32 = arith.constant 0 : i32
    %0 = arith.cmpi eq, %arg0, %c0_i32 : i32
    %1 = arith.extui %0 : i1 to i32
    %c0_i32_0 = arith.constant 0 : i32
    %2 = arith.cmpi ne, %1, %c0_i32_0 : i32
    scf.if %2 {
      %cst = arith.constant 0.000000e+00 : f32
      %8 = vector.broadcast %cst : f32 to vector<2x1xf32>
      %c0_2 = arith.constant 0 : index
      %c0_3 = arith.constant 0 : index
      %9 = vector.load %arg8[%c0_2, %c0_3] : memref<2x1xf32, #tpu.memory_space<vmem>>, vector<2x1xf32>
      tpu.vector_store %arg8[%c0_2, %c0_3], %8 {strides = array<i32>} : memref<2x1xf32, #tpu.memory_space<vmem>>, vector<2x1xf32>,
      %cst_4 = arith.constant 0.000000e+00 : f32
      %10 = vector.broadcast %cst_4 : f32 to vector<2x1xf32>
      %c0_5 = arith.constant 0 : index
      %c0_6 = arith.constant 0 : index
      %11 = vector.load %arg9[%c0_5, %c0_6] : memref<2x1xf32, #tpu.memory_space<vmem>>, vector<2x1xf32>
      tpu.vector_store %arg9[%c0_5, %c0_6], %10 {strides = array<i32>} : memref<2x1xf32, #tpu.memory_space<vmem>>, vector<2x1xf32>,
      %cst_7 = arith.constant 0.000000e+00 : f32
      %12 = vector.broadcast %cst_7 : f32 to vector<2x1xf32>
      %c0_8 = arith.constant 0 : index
      %c0_9 = arith.constant 0 : index
      %13 = vector.load %arg10[%c0_8, %c0_9] : memref<2x1xf32, #tpu.memory_space<vmem>>, vector<2x1xf32>
      tpu.vector_store %arg10[%c0_8, %c0_9], %12 {strides = array<i32>} : memref<2x1xf32, #tpu.memory_space<vmem>>, vector<2x1xf32>,
    } else {
    }
    %c16_i32 = arith.constant 16 : i32
    %3 = arith.muli %arg0, %c16_i32 : i32
    %c0 = arith.constant 0 : index
    %4 = memref.load %arg1[%c0] : memref<2xi32, #tpu.memory_space<smem>>
    %5 = arith.cmpi slt, %3, %4 : i32
    %6 = arith.extui %5 : i1 to i32
    %c0_i32_1 = arith.constant 0 : i32
    %7 = arith.cmpi ne, %6, %c0_i32_1 : i32
    scf.if %7 {
      %c0_2 = arith.constant 0 : index
      %c0_3 = arith.constant 0 : index
      %8 = vector.load %arg2[%c0_2, %c0_3] : memref<2x1xi32, #tpu.memory_space<vmem>>, vector<2x1xi32>
      %c16_i32_4 = arith.constant 16 : i32
      %9 = arith.muli %arg0, %c16_i32_4 : i32
      %10 = vector.broadcast %9 : i32 to vector<2x1xi32>
      %11 = arith.subi %8, %10 : vector<2x1xi32>
      %12 = tpu.iota {dimensions = array<i32: 1>} : vector<2x256xi32>
      %c16_i32_5 = arith.constant 16 : i32
      %13 = vector.broadcast %c16_i32_5 : i32 to vector<2x1xi32>
      %14 = arith.muli %11, %13 : vector<2x1xi32>
      %15 = vector.broadcast %14 : vector<2x1xi32> to vector<2x256xi32>
      %16 = arith.cmpi slt, %12, %15 : vector<2x256xi32>
      %c0_6 = arith.constant 0 : index
      %c0_7 = arith.constant 0 : index
      %17 = vector.load %arg3[%c0_6, %c0_7] : memref<2x256xf32, #tpu.memory_space<vmem>>, vector<2x256xf32>
      %c0_8 = arith.constant 0 : index
      %c0_9 = arith.constant 0 : index
      %18 = vector.load %arg4[%c0_8, %c0_9] : memref<2x256xf32, #tpu.memory_space<vmem>>, vector<2x256xf32>
      %c0_10 = arith.constant 0 : index
      %c0_11 = arith.constant 0 : index
      %19 = vector.load %arg5[%c0_10, %c0_11] : memref<2x256xf32, #tpu.memory_space<vmem>>, vector<2x256xf32>
      %20 = arith.subf %17, %19 : vector<2x256xf32>
      %cst = arith.constant 0.000000e+00 : f32
      %21 = vector.broadcast %cst : f32 to vector<2x256xf32>
      %22 = arith.select %16, %20, %21 : vector<2x256xi1>, vector<2x256xf32>
      %23 = arith.subf %18, %19 : vector<2x256xf32>
      %cst_12 = arith.constant 0.000000e+00 : f32
      %24 = vector.broadcast %cst_12 : f32 to vector<2x256xf32>
      %25 = arith.select %16, %23, %24 : vector<2x256xi1>, vector<2x256xf32>
      %c0_13 = arith.constant 0 : index
      %c0_14 = arith.constant 0 : index
      %26 = vector.load %arg8[%c0_13, %c0_14] : memref<2x1xf32, #tpu.memory_space<vmem>>, vector<2x1xf32>
      %27 = math.absf %22 : vector<2x256xf32>
      %28 = math.absf %25 : vector<2x256xf32>
      %29 = arith.addf %27, %28 : vector<2x256xf32>
      %cst_15 = arith.constant dense<0.000000e+00> : vector<2xf32>
      %30 = vector.multi_reduction <add>, %29, %cst_15 [1] : vector<2x256xf32> to vector<2xf32>
      %31 = vector.shape_cast %30 : vector<2xf32> to vector<2x1xf32>
      %32 = arith.addf %26, %31 : vector<2x1xf32>
      %c0_16 = arith.constant 0 : index
      %c0_17 = arith.constant 0 : index
      %33 = vector.load %arg8[%c0_16, %c0_17] : memref<2x1xf32, #tpu.memory_space<vmem>>, vector<2x1xf32>
      tpu.vector_store %arg8[%c0_16, %c0_17], %32 {strides = array<i32>} : memref<2x1xf32, #tpu.memory_space<vmem>>, vector<2x1xf32>,
      %c0_18 = arith.constant 0 : index
      %c0_19 = arith.constant 0 : index
      %34 = vector.load %arg9[%c0_18, %c0_19] : memref<2x1xf32, #tpu.memory_space<vmem>>, vector<2x1xf32>
      %35 = arith.mulf %22, %22 : vector<2x256xf32>
      %36 = arith.mulf %25, %25 : vector<2x256xf32>
      %37 = arith.addf %35, %36 : vector<2x256xf32>
      %cst_20 = arith.constant dense<0.000000e+00> : vector<2xf32>
      %38 = vector.multi_reduction <add>, %37, %cst_20 [1] : vector<2x256xf32> to vector<2xf32>
      %39 = vector.shape_cast %38 : vector<2xf32> to vector<2x1xf32>
      %40 = arith.addf %34, %39 : vector<2x1xf32>
      %c0_21 = arith.constant 0 : index
      %c0_22 = arith.constant 0 : index
      %41 = vector.load %arg9[%c0_21, %c0_22] : memref<2x1xf32, #tpu.memory_space<vmem>>, vector<2x1xf32>
      tpu.vector_store %arg9[%c0_21, %c0_22], %40 {strides = array<i32>} : memref<2x1xf32, #tpu.memory_space<vmem>>, vector<2x1xf32>,
      %42 = tpu.iota {dimensions = array<i32: 1>} : vector<2x16xi32>
      %43 = vector.broadcast %11 : vector<2x1xi32> to vector<2x16xi32>
      %44 = arith.cmpi slt, %42, %43 : vector<2x16xi32>
      %c0_23 = arith.constant 0 : index
      %c0_24 = arith.constant 0 : index
      %45 = vector.load %arg6[%c0_23, %c0_24] : memref<2x16xf32, #tpu.memory_space<vmem>>, vector<2x16xf32>
      %c0_25 = arith.constant 0 : index
      %c0_26 = arith.constant 0 : index
      %46 = vector.load %arg7[%c0_25, %c0_26] : memref<2x16xf32, #tpu.memory_space<vmem>>, vector<2x16xf32>
      %cst_27 = arith.constant 0.000000e+00 : f32
      %47 = vector.broadcast %cst_27 : f32 to vector<2x16xf32>
      %48 = arith.maximumf %45, %47 : vector<2x16xf32>
      %49 = arith.mulf %45, %46 : vector<2x16xf32>
      %50 = arith.subf %48, %49 : vector<2x16xf32>
      %51 = math.absf %45 : vector<2x16xf32>
      %cst_28 = arith.constant 0.000000e+00 : f32
      %52 = vector.broadcast %cst_28 : f32 to vector<2x16xf32>
      %53 = arith.subf %52, %51 : vector<2x16xf32>
      %54 = math.exp %53 : vector<2x16xf32>
      %55 = math.log1p %54 : vector<2x16xf32>
      %56 = arith.addf %50, %55 : vector<2x16xf32>
      %c0_29 = arith.constant 0 : index
      %c0_30 = arith.constant 0 : index
      %57 = vector.load %arg10[%c0_29, %c0_30] : memref<2x1xf32, #tpu.memory_space<vmem>>, vector<2x1xf32>
      %cst_31 = arith.constant 0.000000e+00 : f32
      %58 = vector.broadcast %cst_31 : f32 to vector<2x16xf32>
      %59 = arith.select %44, %56, %58 : vector<2x16xi1>, vector<2x16xf32>
      %cst_32 = arith.constant dense<0.000000e+00> : vector<2xf32>
      %60 = vector.multi_reduction <add>, %59, %cst_32 [1] : vector<2x16xf32> to vector<2xf32>
      %61 = vector.shape_cast %60 : vector<2xf32> to vector<2x1xf32>
      %62 = arith.addf %57, %61 : vector<2x1xf32>
      %c0_33 = arith.constant 0 : index
      %c0_34 = arith.constant 0 : index
      %63 = vector.load %arg10[%c0_33, %c0_34] : memref<2x1xf32, #tpu.memory_space<vmem>>, vector<2x1xf32>
      tpu.vector_store %arg10[%c0_33, %c0_34], %62 {strides = array<i32>} : memref<2x1xf32, #tpu.memory_space<vmem>>, vector<2x1xf32>,
    } else {
    }
    return
  }
  func.func @transform_0(%arg0: i32, %arg1: memref<2xi32, #tpu.memory_space<smem>>) -> (i32, i32) {
    %c0_i32 = arith.constant 0 : i32
    %c0_i32_0 = arith.constant 0 : i32
    %c0_i32_1 = arith.constant 0 : i32
    return %c0_i32, %c0_i32_0 : i32, i32
  }
  func.func @transform_1(%arg0: i32, %arg1: memref<2xi32, #tpu.memory_space<smem>>) -> (i32, i32) {
    %c1 = arith.constant 1 : index
    %0 = memref.load %arg1[%c1] : memref<2xi32, #tpu.memory_space<smem>>
    %1 = arith.minsi %arg0, %0 : i32
    %c0_i32 = arith.constant 0 : i32
    %c0_i32_0 = arith.constant 0 : i32
    return %c0_i32, %1 : i32, i32
  }
  func.func @transform_2(%arg0: i32, %arg1: memref<2xi32, #tpu.memory_space<smem>>) -> (i32, i32) {
    %c1 = arith.constant 1 : index
    %0 = memref.load %arg1[%c1] : memref<2xi32, #tpu.memory_space<smem>>
    %1 = arith.minsi %arg0, %0 : i32
    %c0_i32 = arith.constant 0 : i32
    %c0_i32_0 = arith.constant 0 : i32
    return %c0_i32, %1 : i32, i32
  }
  func.func @transform_3(%arg0: i32, %arg1: memref<2xi32, #tpu.memory_space<smem>>) -> (i32, i32) {
    %c1 = arith.constant 1 : index
    %0 = memref.load %arg1[%c1] : memref<2xi32, #tpu.memory_space<smem>>
    %1 = arith.minsi %arg0, %0 : i32
    %c0_i32 = arith.constant 0 : i32
    %c0_i32_0 = arith.constant 0 : i32
    return %c0_i32, %1 : i32, i32
  }
  func.func @transform_4(%arg0: i32, %arg1: memref<2xi32, #tpu.memory_space<smem>>) -> (i32, i32) {
    %c1 = arith.constant 1 : index
    %0 = memref.load %arg1[%c1] : memref<2xi32, #tpu.memory_space<smem>>
    %1 = arith.minsi %arg0, %0 : i32
    %c0_i32 = arith.constant 0 : i32
    %c0_i32_0 = arith.constant 0 : i32
    return %c0_i32, %1 : i32, i32
  }
  func.func @transform_5(%arg0: i32, %arg1: memref<2xi32, #tpu.memory_space<smem>>) -> (i32, i32) {
    %c1 = arith.constant 1 : index
    %0 = memref.load %arg1[%c1] : memref<2xi32, #tpu.memory_space<smem>>
    %1 = arith.minsi %arg0, %0 : i32
    %c0_i32 = arith.constant 0 : i32
    %c0_i32_0 = arith.constant 0 : i32
    return %c0_i32, %1 : i32, i32
  }
  func.func @transform_6(%arg0: i32, %arg1: memref<2xi32, #tpu.memory_space<smem>>) -> (i32, i32) {
    %c0_i32 = arith.constant 0 : i32
    %c0_i32_0 = arith.constant 0 : i32
    %c0_i32_1 = arith.constant 0 : i32
    return %c0_i32, %c0_i32_0 : i32, i32
  }
  func.func @transform_7(%arg0: i32, %arg1: memref<2xi32, #tpu.memory_space<smem>>) -> (i32, i32) {
    %c0_i32 = arith.constant 0 : i32
    %c0_i32_0 = arith.constant 0 : i32
    %c0_i32_1 = arith.constant 0 : i32
    return %c0_i32, %c0_i32_0 : i32, i32
  }
  func.func @transform_8(%arg0: i32, %arg1: memref<2xi32, #tpu.memory_space<smem>>) -> (i32, i32) {
    %c0_i32 = arith.constant 0 : i32
    %c0_i32_0 = arith.constant 0 : i32
    %c0_i32_1 = arith.constant 0 : i32
    return %c0_i32, %c0_i32_0 : i32, i32
  }
}

</mosaic_0001>

<bundles_post_ra>
// kernel: translacotron_loss.2
= control target key start
LH: loop header
LB: loop body
LE: loop exit
PB: predicated region body
PF: predicated region fallthrough
CT: control target
= control target key end

     0   :  { %s510_s0 = inlined_call_operand.vmem [shape: s32[2], index: 0, kind: input, shape index: {}]   ;;  %s511_s1 = inlined_call_operand.vmem [shape: s32[2,1], index: 1, kind: input, shape index: {}]   ;;  %s512_s2 = inlined_call_operand.vmem [shape: f32[2,256], index: 2, kind: input, shape index: {}]   ;;  %s513_s3 = inlined_call_operand.vmem [shape: f32[2,256], index: 3, kind: input, shape index: {}]   ;;  %s514_s4 = inlined_call_operand.vmem [shape: f32[2,256], index: 4, kind: input, shape index: {}]   ;;  %s515_s5 = inlined_call_operand.vmem [shape: f32[2,16], index: 5, kind: input, shape index: {}]   ;;  %s516_s6 = inlined_call_operand.vmem [shape: f32[2,16], index: 6, kind: input, shape index: {}]   ;;  %s517_s7 = inlined_call_operand.vmem [shape: f32[2,1], index: 7, kind: output, shape index: {0}]   ;;  %s518_s8 = inlined_call_operand.vmem [shape: f32[2,1], index: 8, kind: output, shape index: {1}]   ;;  %s519_s9 = inlined_call_operand.vmem [shape: f32[2,1], index: 9, kind: output, shape index: {2}]  }
   0x1   :  { %s15_s11 = sshll.u32 %s510_s0, 4  ;;  %s16_s11 = int_to_ptr.vmem [resolvable:$true] %s15_s11 }
   0x2   :  { %s378_s12 = scalar_lea.vmem %s16_s11, 16  ;;  %p383_p1 = scmp.lt.s32.totalorder %s16_s11, %s16_s11 }
   0x3   :  { %p379_p0 = scmp.ne.s32.totalorder %s16_s11, %s378_s12  ;;  %p384_p2 = scmp.lt.s32.totalorder %s378_s12, %s378_s12 }
   0x5   :  { %p385_p3 = por %p384_p2, %p383_p1 }
   0x7   :  { %p386_p4 = pnand %p385_p3, %p379_p0 }
   0x9   :  { %389 = shalt.err (!%p386_p4)  }
   0xa   :  { %s392_s13 = smov [#allocation3]  }
   0xb   :  { %18 = dma.vmem_to_smem %s16_s11, 16, %s392_s13, [#allocation2] }
   0xc   :  { %390 = dma.done.wait [#allocation2], 16 }
   0xd   :  { %391 = vsyncadd [#allocation2], 4294967280 }
   0xe   :  { %20 = sfence }
   0xf   :  { %s343_s14 = sld [smem:[#allocation3 + $0x1]]  ;;  %vm187_vm0 = vcmask 1024   ;;  %v393_v0 = vmov 0.0  }
  0x10   :  { %188 = vst.msk [vmem:[%s517_s7] sm:$0x3] %vm187_vm0, %v393_v0  ;;  %189 = vst.msk [vmem:[%s518_s8] sm:$0x3] %vm187_vm0, %v393_v0  ;;  %s192_s20 = sld [smem:[#allocation3]] }
  0x11   :  { %190 = vst.msk [vmem:[%s519_s9] sm:$0x3] %vm187_vm0, %v393_v0 }
  0x15   :  { %p344_p5 = scmp.gt.s32.totalorder %s343_s14, 0  ;;  %p358_p6 = scmp.lt.s32.totalorder %s343_s14, 0 }
  0x16   :  { %p368_p8 = scmp.le.s32.totalorder %s192_s20, 0 }
  0x17   :  { %s521_s14 = smov (%p344_p5, %s343_s14), 0 }
  0x18   :  { %s345_s21 = sshll.u32 %s521_s14, 1  ;;  %s523_s14 = smov (!%p358_p6, %s521_s14), 0 }
  0x19   :  { %p131_p7 = scmp.lt.s32.totalorder %s345_s21, 1  ;;  %s360_s22 = sshll.u32 %s523_s14, 1 }
  0x1a   :  { %s169_s26 = scalar_lea.vmem %s515_s5, %s360_s22  ;;  %s179_s0 = scalar_lea.vmem %s516_s6, %s360_s22 }
  0x1b   :  { %s525_s21 = smov (!%p131_p7, %s345_s21), 1  ;;  %196 = sbr.rel (%p368_p8) target bundleno = 314 (0x13a), region = 33 }
  0x1c   :  { %s461_s23 = sshll.u32 %s525_s21, 1 }
  0x1d   :  { %s134_s29 = scalar_lea.vmem %s512_s2, %s461_s23  ;;  %s146_s11 = scalar_lea.vmem %s513_s3, %s461_s23 }
  0x1e   :  { %s158_s14 = scalar_lea.vmem %s514_s4, %s461_s23 }
  0x20   :  { %v197_v1 = vld [vmem:[%s511_s1] sm:$0x3]  ;;  %v394_v2 = vmov 0   ;;  %v200_v10 = vlaneseq  ;;  %v395_v11 = vmov 1983009808   ;;  %vm295_vm2 = vcmask 123904  }
  0x21   :  { %373 = vset.pattern.permute.xlu0 %v394_v2  ;;  %v203_v3 = vmul.u32 16, %v197_v1  ;;  %v274_v4 = vld [vmem:[%s169_s26] sm:$0x3]  ;;  %v215_v12 = vunpack.c.l.s4 %v395_v11  ;;  %vm247_vm5 = vcmask 1041408  }
  0x22   :  { %v279_v5 = vand.u32 2147483647, %v274_v4  ;;  %v218_v14 = vshrl.u32 %v200_v10, 7  ;;  %v209_v16 = vld [vmem:[%s134_s29] sm:$0xf]  ;;  %v201_v26 = vand.u32 127, %v200_v10 }
  0x23   :  { %205 = vperm.xlu0 %373, %v203_v3   ;;  %v216_v13 = vunpack.c.0.s8 %v215_v12  ;;  %v210_v17 = vld [vmem:[%s146_s11] sm:$0xf]  ;;  %v276_v27 = vmax.f32 %v274_v4, 0.0 }
  0x24   :  { %v280_v6 = vsub.f32 0.0, %v279_v5  ;;  %v211_v18 = vld [vmem:[%s158_s14] sm:$0xf]  ;;  %v202_v33 = vadd.s32 128, %v201_v26 }
  0x25   :  { %v212_v19 = vsub.f32 %v209_v16, %v211_v18  ;;  %v219_v20 = vsub.s32 %v216_v13, %v218_v14  ;;  %v226_v21 = vsub.f32 %v210_v17, %v211_v18  ;;  %v275_v22 = vld [vmem:[%s179_s0] sm:$0x3] }
  0x26   :  { %v281_v7 = vmul.f32 1.442695, %v280_v6  ;;  %v277_v28 = vmul.f32 %v275_v22, %v274_v4  ;;  %v240_v4 = vld [vmem:[%s517_s7] sm:$0x3] }
  0x27   :  { %271 = vperm.xlu0 %373, %v197_v1   ;;  %v220_v29 = vrot.slane %v212_v19, %v219_v20  ;;  %v234_v30 = vrot.slane %v226_v21, %v219_v20  ;;  %v293_v1 = vld [vmem:[%s519_s9] sm:$0x3] }
  0x28   :  { %374 = vpow2.f32 %v281_v7  ;;  %v278_v34 = vsub.f32 %v276_v27, %v277_v28  ;;  %v256_v7 = vld [vmem:[%s518_s8] sm:$0x3] }
  0x29   :  { %v221_v35 = vcombine.high %v220_v29, %v220_v29  ;;  %v235_v36 = vcombine.high %v234_v30, %v234_v30 }
  0x35   :  { %v375_v8 = vpop.eup %374 }
  0x36   :  { %v283_v9 = vadd.f32 1.0, %v375_v8  ;;  %v286_v15 = vmul.f32 -0.5, %v375_v8  ;;  %v289_v25 = vand.u32 2147483647, %v375_v8 }
  0x38   :  { %376 = vlog2.f32 %v283_v9  ;;  %v287_v23 = vadd.f32 1.0, %v286_v15  ;;  %vm290_vm1 = vcmp.lt.f32.partialorder %v289_v25, 0.0004427343 }
  0x3a   :  { %v288_v32 = vmul.f32 %v375_v8, %v287_v23 }
  0x45   :  { %v377_v24 = vpop.eup %376 }
  0x46   :  { %v285_v31 = vmul.f32 0.6931472, %v377_v24 }
  0x48   :  { %v291_v37 = vsel %vm290_vm1, %v288_v32, %v285_v31 }
  0x49   :  { %v292_v39 = vadd.f32 %v291_v37, %v278_v34 }
  0x9e   :  { %v206_v38 = vpop.permute.xlu0 %205 }
  0x9f   :  { %vm207_vm3 = vcmp.lt.s32.totalorder %v201_v26, %v206_v38  ;;  %vm208_vm4 = vcmp.lt.s32.totalorder %v202_v33, %v206_v38 }
  0xa0   :  { %v224_v40 = vsel %vm207_vm3, %v220_v29, 0.0  ;;  %v225_v41 = vsel %vm208_vm4, %v221_v35, 0.0  ;;  %v238_v42 = vsel %vm207_vm3, %v234_v30, 0.0  ;;  %v239_v43 = vsel %vm208_vm4, %v235_v36, 0.0 }
  0xa1   :  { %v241_v44 = vand.u32 2147483647, %v224_v40  ;;  %v242_v45 = vand.u32 2147483647, %v225_v41  ;;  %v243_v46 = vand.u32 2147483647, %v238_v42  ;;  %v257_v47 = vmul.f32 %v224_v40, %v224_v40 }
  0xa2   :  { %v244_v48 = vand.u32 2147483647, %v239_v43  ;;  %v258_v49 = vmul.f32 %v225_v41, %v225_v41  ;;  %v259_v50 = vmul.f32 %v238_v42, %v238_v42  ;;  %v260_v51 = vmul.f32 %v239_v43, %v239_v43  ;;  %v272_v52 = vpop.permute.xlu0 %271 }
  0xa3   :  { %vm273_vm6 = vcmp.lt.s32.totalorder %v201_v26, %v272_v52  ;;  %v245_v53 = vadd.f32 %v243_v46, %v241_v44 }
  0xa4   :  { %v294_v54 = vsel %vm273_vm6, %v292_v39, 0.0  ;;  %v246_v55 = vadd.f32 %v244_v48, %v242_v45  ;;  %v261_v56 = vadd.f32 %v259_v50, %v257_v47  ;;  %v262_v57 = vadd.f32 %v260_v51, %v258_v49 }
  0xa5   :  { %v296_v58 = vsel %vm295_vm2, %v294_v54, 0.0  ;;  %v248_v59 = vsel %vm247_vm5, %v245_v53, 0.0 }
  0xa6   :  { %297 = vadd.xlane.f32.xlu0 %v296_v58  ;;  %v249_v60 = vsel %vm247_vm5, %v246_v55, 0.0  ;;  %v263_v62 = vsel %vm247_vm5, %v261_v56, 0.0  ;;  %v264_v63 = vsel %vm247_vm5, %v262_v57, 0.0 }
  0xa7   :  { %v250_v61 = vadd.f32 %v249_v60, %v248_v59  ;;  %v265_v0 = vadd.f32 %v264_v63, %v263_v62 }
  0xa9   :  { %251 = vadd.xlane.f32.xlu1 %v250_v61 }
  0xad   :  { %266 = vadd.xlane.f32.xlu1 %v265_v0 }
 0x12f   :  { %v298_v2 = vpop.xlane.xlu0 %297 }
 0x130   :  { %v299_v3 = vadd.f32 %v298_v2, %v293_v1 }
 0x132   :  { %300 = vst.msk [vmem:[%s519_s9] sm:$0x3] %vm187_vm0, %v299_v3  ;;  %v252_v5 = vpop.xlane.xlu1 %251 }
 0x133   :  { %v253_v6 = vadd.f32 %v252_v5, %v240_v4 }
 0x135   :  { %255 = vst.msk [vmem:[%s517_s7] sm:$0x3] %vm187_vm0, %v253_v6 }
 0x136   :  { %v267_v8 = vpop.xlane.xlu1 %266 }
 0x137   :  { %v268_v9 = vadd.f32 %v267_v8, %v256_v7 }
 0x139   :  { %269 = vst.msk [vmem:[%s518_s8] sm:$0x3] %vm187_vm0, %v268_v9 }
 0x13a PF:  {}

// kernel: translacotron_loss.3
= control target key start
LH: loop header
LB: loop body
LE: loop exit
PB: predicated region body
PF: predicated region fallthrough
CT: control target
= control target key end

     0   :  { %s1209_s0 = inlined_call_operand.vmem [shape: s32[2], index: 0, kind: input, shape index: {}]   ;;  %s1210_s1 = inlined_call_operand.vmem [shape: s32[2,1,1], index: 1, kind: input, shape index: {}]   ;;  %s1211_s2 = inlined_call_operand.vmem [shape: s32[2,1,1], index: 2, kind: input, shape index: {}]   ;;  %s1212_s3 = inlined_call_operand.vmem [shape: f32[2,16,32], index: 3, kind: input, shape index: {}]   ;;  %s1213_s4 = inlined_call_operand.vmem [shape: f32[2,16,32], index: 4, kind: input, shape index: {}]   ;;  %s1214_s5 = inlined_call_operand.vmem [shape: s32[2,16,1], index: 5, kind: input, shape index: {}]   ;;  %s1215_s6 = inlined_call_operand.vmem [shape: s32[2,16,1], index: 6, kind: input, shape index: {}]   ;;  %s1216_s7 = inlined_call_operand.vmem [shape: f32[2,1], index: 7, kind: output, shape index: {0}]   ;;  %s1217_s8 = inlined_call_operand.vmem [shape: f32[2,1], index: 8, kind: output, shape index: {1}]  }
   0x1   :  { %s14_s29 = sshll.u32 %s1209_s0, 4  ;;  %s15_s29 = int_to_ptr.vmem [resolvable:$true] %s14_s29 }
   0x2   :  { %s796_s30 = scalar_lea.vmem %s15_s29, 16  ;;  %p801_p1 = scmp.lt.s32.totalorder %s15_s29, %s15_s29 }
   0x3   :  { %p797_p0 = scmp.ne.s32.totalorder %s15_s29, %s796_s30  ;;  %p802_p2 = scmp.lt.s32.totalorder %s796_s30, %s796_s30 }
   0x5   :  { %p803_p3 = por %p802_p2, %p801_p1 }
   0x7   :  { %p804_p4 = pnand %p803_p3, %p797_p0 }
   0x9   :  { %807 = shalt.err (!%p804_p4)  }
   0xa   :  { %s810_s9 = smov [#allocation9]  }
   0xb   :  { %17 = dma.vmem_to_smem %s15_s29, 16, %s810_s9, [#allocation8] }
   0xc   :  { %808 = dma.done.wait [#allocation8], 16 }
   0xd   :  { %809 = vsyncadd [#allocation8], 4294967280 }
   0xe   :  { %19 = sfence }
   0xf   :  { %s708_s10 = sld [smem:[#allocation9 + $0x1]]  ;;  %vm169_vm0 = vcmask 1024   ;;  %v811_v0 = vmov 0.0  }
  0x10   :  { %s864_s11 = sld [smem:[#allocation9]]  ;;  %170 = vst.msk [vmem:[%s1216_s7] sm:$0x3] %vm169_vm0, %v811_v0  ;;  %171 = vst.msk [vmem:[%s1217_s8] sm:$0x3] %vm169_vm0, %v811_v0 }
  0x15   :  { %p709_p5 = scmp.gt.s32.totalorder %s708_s10, 0 }
  0x16   :  { %p724_p6 = scmp.gt.s32.totalorder %s864_s11, 0 }
  0x17   :  { %s1219_s10 = smov (%p709_p5, %s708_s10), 0  ;;  %vm176_vm1 = vcmask (%p724_p6), 7168   ;;  %v812_v1 = vmov (%p724_p6), -1e+30   ;;  %v813_v2 = vmov (%p724_p6), 0.0  }
  0x18   :  { %s710_s15 = sshll.u32 %s1219_s10, 1  ;;  %177 = vst.msk [vmem:[#allocation2] sm:$0xff] (%p724_p6), %vm176_vm1, %v812_v1  ;;  %178 = vst.msk [vmem:[#allocation2 + $0x8] sm:$0xff] (%p724_p6), %vm176_vm1, %v812_v1 }
  0x19   :  { %p116_p7 = scmp.lt.s32.totalorder %s710_s15, 1  ;;  %179 = vst.msk [vmem:[#allocation2 + $0x10] sm:$0xff] (%p724_p6), %vm176_vm1, %v812_v1  ;;  %180 = vst.msk [vmem:[#allocation2 + $0x18] sm:$0xff] (%p724_p6), %vm176_vm1, %v812_v1 }
  0x1a   :  { %175 = sbr.rel (!%p724_p6) target bundleno = 36 (0x24), region = 33  ;;  %189 = vst.msk [vmem:[#allocation5] sm:$0xff] (%p724_p6), %vm176_vm1, %v812_v1  ;;  %190 = vst.msk [vmem:[#allocation5 + $0x8] sm:$0xff] (%p724_p6), %vm176_vm1, %v812_v1 }
  0x1b   :  { %s1221_s15 = smov (!%p116_p7, %s710_s15), 1  ;;  %191 = vst.msk [vmem:[#allocation5 + $0x10] sm:$0xff] (%p724_p6), %vm176_vm1, %v812_v1  ;;  %192 = vst.msk [vmem:[#allocation5 + $0x18] sm:$0xff] (%p724_p6), %vm176_vm1, %v812_v1 }
  0x1c   :  { %s711_s16 = sshll.u32 %s1221_s15, 3  ;;  %181 = vst.msk [vmem:[#allocation3] sm:$0xff] (%p724_p6), %vm176_vm1, %v813_v2  ;;  %182 = vst.msk [vmem:[#allocation3 + $0x8] sm:$0xff] (%p724_p6), %vm176_vm1, %v813_v2 }
  0x1d   :  { %s878_s19 = scalar_lea.vmem %s1212_s3, %s711_s16  ;;  %s883_s22 = scalar_lea.vmem %s1213_s4, %s711_s16  ;;  %183 = vst.msk [vmem:[#allocation3 + $0x10] sm:$0xff] (%p724_p6), %vm176_vm1, %v813_v2  ;;  %184 = vst.msk [vmem:[#allocation3 + $0x18] sm:$0xff] (%p724_p6), %vm176_vm1, %v813_v2 }
  0x1e   :  { %s888_s25 = scalar_lea.vmem %s1214_s5, %s711_s16  ;;  %s893_s28 = scalar_lea.vmem %s1215_s6, %s711_s16  ;;  %185 = vst.msk [vmem:[#allocation4] sm:$0xff] (%p724_p6), %vm176_vm1, %v813_v2  ;;  %186 = vst.msk [vmem:[#allocation4 + $0x8] sm:$0xff] (%p724_p6), %vm176_vm1, %v813_v2 }
  0x1f   :  { %187 = vst.msk [vmem:[#allocation4 + $0x10] sm:$0xff] %vm176_vm1, %v813_v2  ;;  %188 = vst.msk [vmem:[#allocation4 + $0x18] sm:$0xff] %vm176_vm1, %v813_v2 }
  0x20   :  { %193 = vst.msk [vmem:[#allocation6] sm:$0xff] %vm176_vm1, %v813_v2  ;;  %194 = vst.msk [vmem:[#allocation6 + $0x8] sm:$0xff] %vm176_vm1, %v813_v2 }
  0x21   :  { %195 = vst.msk [vmem:[#allocation6 + $0x10] sm:$0xff] %vm176_vm1, %v813_v2  ;;  %196 = vst.msk [vmem:[#allocation6 + $0x18] sm:$0xff] %vm176_vm1, %v813_v2 }
  0x22   :  { %197 = vst.msk [vmem:[#allocation7] sm:$0xff] %vm176_vm1, %v813_v2  ;;  %198 = vst.msk [vmem:[#allocation7 + $0x8] sm:$0xff] %vm176_vm1, %v813_v2 }
  0x23   :  { %199 = vst.msk [vmem:[#allocation7 + $0x10] sm:$0xff] %vm176_vm1, %v813_v2  ;;  %200 = vst.msk [vmem:[#allocation7 + $0x18] sm:$0xff] %vm176_vm1, %v813_v2 }
  0x24 PF:  { %p726_p8 = scmp.le.s32.totalorder %s864_s11, 0 }
  0x26   :  { %203 = sbr.rel (%p726_p8) target bundleno = 516 (0x204), region = 37 }
  0x2b   :  { %v923_v3 = vld [vmem:[%s878_s19] sm:$0xff]  ;;  %vm249_vm2 = vcmask 261120   ;;  %v926_v4 = vld [vmem:[%s878_s19 + $0x8] sm:$0xff]  ;;  %v929_v5 = vld [vmem:[%s878_s19 + $0x10] sm:$0xff]  ;;  %v814_v9 = vmov 0   ;;  %vm266_vm3 = vcmask 7168   ;;  %v209_v53 = vlaneseq }
  0x2c   :  { %v275_v6 = vsel %vm249_vm2, %v923_v3, -inf  ;;  %v281_v7 = vsel %vm249_vm2, %v929_v5, -inf  ;;  %v936_v8 = vld [vmem:[%s878_s19 + $0x18] sm:$0xff]  ;;  %746 = vset.pattern.permute.xlu0 %v814_v9  ;;  %747 = vset.pattern.permute.xlu1 %v814_v9  ;;  %v278_v10 = vsel %vm249_vm2, %v926_v4, -inf  ;;  %v943_v12 = vld [vmem:[%s883_s22] sm:$0xff]  ;;  %v946_v13 = vld [vmem:[%s883_s22 + $0x8] sm:$0xff] }
  0x2d   :  { %276 = vmax.xlane.f32.xlu0 %v275_v6  ;;  %282 = vmax.xlane.f32.xlu1 %v281_v7  ;;  %v284_v11 = vsel %vm249_vm2, %v936_v8, -inf  ;;  %v431_v14 = vsel %vm249_vm2, %v943_v12, -inf  ;;  %v434_v15 = vsel %vm249_vm2, %v946_v13, -inf  ;;  %v953_v16 = vld [vmem:[%s883_s22 + $0x10] sm:$0xff]  ;;  %v956_v17 = vld [vmem:[%s883_s22 + $0x18] sm:$0xff]  ;;  %v214_v20 = vld [vmem:[%s888_s25 + $0x8] sm:$0xff] }
  0x2e   :  { %v437_v18 = vsel %vm249_vm2, %v953_v16, -inf  ;;  %v440_v19 = vsel %vm249_vm2, %v956_v17, -inf  ;;  %v215_v21 = vld [vmem:[%s888_s25 + $0x10] sm:$0xff]  ;;  %v213_v22 = vld [vmem:[%s888_s25] sm:$0xff]  ;;  %v216_v23 = vld [vmem:[%s888_s25 + $0x18] sm:$0xff]  ;;  %v1042_v57 = vand.u32 127, %v209_v53 }
  0x2f   :  { %v966_v24 = vld [vmem:[#allocation2] sm:$0xff]  ;;  %v968_v25 = vld [vmem:[#allocation2 + $0x10] sm:$0xff]  ;;  %v976_v30 = vld [vmem:[#allocation2 + $0x8] sm:$0xff]  ;;  %v815_v59 = vmov 0.0  }
  0x30   :  { %v978_v31 = vld [vmem:[#allocation2 + $0x18] sm:$0xff]  ;;  %v995_v38 = vld [vmem:[#allocation5] sm:$0xff]  ;;  %v997_v39 = vld [vmem:[#allocation5 + $0x8] sm:$0xff] }
  0x31   :  { %279 = vmax.xlane.f32.xlu0 %v278_v10  ;;  %285 = vmax.xlane.f32.xlu1 %v284_v11  ;;  %v1014_v46 = vld [vmem:[#allocation5 + $0x10] sm:$0xff]  ;;  %v1016_v47 = vld [vmem:[#allocation5 + $0x18] sm:$0xff]  ;;  %v371_v63 = vld [vmem:[%s893_s28] sm:$0xff] }
  0x32   :  { %v372_v0 = vld [vmem:[%s893_s28 + $0x8] sm:$0xff]  ;;  %v374_v1 = vld [vmem:[%s893_s28 + $0x18] sm:$0xff]  ;;  %v373_v2 = vld [vmem:[%s893_s28 + $0x10] sm:$0xff] }
  0x35   :  { %432 = vmax.xlane.f32.xlu0 %v431_v14  ;;  %435 = vmax.xlane.f32.xlu1 %v434_v15 }
  0x39   :  { %438 = vmax.xlane.f32.xlu0 %v437_v18  ;;  %441 = vmax.xlane.f32.xlu1 %v440_v19 }
  0x4a   :  { %221 = vperm.xlu1 %747, %v214_v20  }
  0x4e   :  { %224 = vperm.xlu1 %747, %v215_v21  }
  0x4f   :  { %218 = vperm.xlu0 %746, %v213_v22  }
  0x52   :  { %227 = vperm.xlu1 %747, %v216_v23  }
  0xb6   :  { %v277_v26 = vpop.xlane.xlu0 %276  ;;  %v283_v27 = vpop.xlane.xlu1 %282 }
  0xb7   :  { %v971_v28 = vmax.f32 %v966_v24, %v277_v26  ;;  %v974_v29 = vmax.f32 %v968_v25, %v283_v27 }
  0xb9   :  { %v295_v32 = vsub.f32 %v966_v24, %v971_v28  ;;  %363 = vst.msk [vmem:[#allocation2] sm:$0xff] %vm266_vm3, %v971_v28  ;;  %313 = vperm.xlu0 %746, %v971_v28   ;;  %v297_v33 = vsub.f32 %v968_v25, %v974_v29  ;;  %365 = vst.msk [vmem:[#allocation2 + $0x10] sm:$0xff] %vm266_vm3, %v974_v29 }
  0xba   :  { %v280_v34 = vpop.xlane.xlu0 %279  ;;  %v286_v35 = vpop.xlane.xlu1 %285 }
  0xbb   :  { %v990_v36 = vmax.f32 %v976_v30, %v280_v34  ;;  %v993_v37 = vmax.f32 %v978_v31, %v286_v35 }
  0xbd   :  { %v296_v40 = vsub.f32 %v976_v30, %v990_v36  ;;  %364 = vst.msk [vmem:[#allocation2 + $0x8] sm:$0xff] %vm266_vm3, %v990_v36  ;;  %318 = vperm.xlu0 %746, %v990_v36   ;;  %v298_v41 = vsub.f32 %v978_v31, %v993_v37  ;;  %366 = vst.msk [vmem:[#allocation2 + $0x18] sm:$0xff] %vm266_vm3, %v993_v37  ;;  %v303_v30 = vmul.f32 1.442695, %v297_v33 }
  0xbe   :  { %v433_v42 = vpop.xlane.xlu0 %432  ;;  %v436_v43 = vpop.xlane.xlu1 %435 }
  0xbf   :  { %v1009_v44 = vmax.f32 %v995_v38, %v433_v42  ;;  %v1012_v45 = vmax.f32 %v997_v39, %v436_v43 }
  0xc1   :  { %v451_v48 = vsub.f32 %v995_v38, %v1009_v44  ;;  %519 = vst.msk [vmem:[#allocation5] sm:$0xff] %vm266_vm3, %v1009_v44  ;;  %323 = vperm.xlu0 %746, %v974_v29   ;;  %v452_v49 = vsub.f32 %v997_v39, %v1012_v45  ;;  %520 = vst.msk [vmem:[#allocation5 + $0x8] sm:$0xff] %vm266_vm3, %v1012_v45  ;;  %v294_v38 = vld [vmem:[#allocation3 + $0x18] sm:$0xff] }
  0xc2   :  { %v439_v50 = vpop.xlane.xlu0 %438  ;;  %v442_v51 = vpop.xlane.xlu1 %441 }
  0xc3   :  { %v1028_v52 = vmax.f32 %v1014_v46, %v439_v50  ;;  %v1031_v54 = vmax.f32 %v1016_v47, %v442_v51  ;;  %v457_v31 = vmul.f32 1.442695, %v452_v49  ;;  %v455_v28 = vmul.f32 1.442695, %v451_v48  ;;  %v401_v49 = vld [vmem:[#allocation7 + $0x10] sm:$0xff] }
  0xc5   :  { %v453_v55 = vsub.f32 %v1014_v46, %v1028_v52  ;;  %521 = vst.msk [vmem:[#allocation5 + $0x10] sm:$0xff] %vm266_vm3, %v1028_v52  ;;  %328 = vperm.xlu0 %746, %v993_v37   ;;  %v454_v56 = vsub.f32 %v1016_v47, %v1031_v54  ;;  %522 = vst.msk [vmem:[#allocation5 + $0x18] sm:$0xff] %vm266_vm3, %v1031_v54  ;;  %v402_v37 = vld [vmem:[#allocation7 + $0x18] sm:$0xff] }
  0xc6   :  { %v222_v6 = vpop.permute.xlu1 %221 }
  0xc7   :  { %vm230_vm7 = vcmp.eq.s32.totalorder %v1042_v57, %v222_v6  ;;  %v241_v6 = vld [vmem:[#allocation4] sm:$0xff]  ;;  %v461_v25 = vmul.f32 1.442695, %v454_v56  ;;  %v459_v39 = vmul.f32 1.442695, %v453_v55 }
  0xc8   :  { %v728_v20 = vsel %vm230_vm7, 1.0, %v815_v59 }
  0xc9   :  { %469 = vperm.xlu0 %746, %v1009_v44   ;;  %v246_v21 = vmul.f32 %v728_v20, %v926_v4 }
  0xca   :  { %v219_v58 = vpop.permute.xlu0 %218  ;;  %v225_v7 = vpop.permute.xlu1 %224 }
  0xcb   :  { %vm229_vm4 = vcmp.eq.s32.totalorder %v1042_v57, %v219_v58  ;;  %vm231_vm5 = vcmp.eq.s32.totalorder %v1042_v57, %v225_v7  ;;  %v253_v22 = vsel %vm249_vm2, %v246_v21, 0.0 }
  0xcc   :  { %v727_v60 = vsel %vm229_vm4, 1.0, %v815_v59  ;;  %v729_v10 = vsel %vm231_vm5, 1.0, %v815_v59 }
  0xcd   :  { %479 = vperm.xlu0 %746, %v1028_v52   ;;  %v245_v61 = vmul.f32 %v727_v60, %v923_v3  ;;  %v247_v11 = vmul.f32 %v729_v10, %v929_v5 }
  0xce   :  { %v228_v9 = vpop.permute.xlu1 %227 }
  0xcf   :  { %v250_v62 = vsel %vm249_vm2, %v245_v61, 0.0  ;;  %vm232_vm6 = vcmp.eq.s32.totalorder %v1042_v57, %v228_v9  ;;  %v256_v15 = vsel %vm249_vm2, %v247_v11, 0.0 }
  0xd0   :  { %251 = vadd.xlane.f32.xlu1 %v250_v62  ;;  %v730_v14 = vsel %vm232_vm6, 1.0, %v815_v59 }
  0xd1   :  { %484 = vperm.xlu0 %746, %v1031_v54   ;;  %v248_v18 = vmul.f32 %v730_v14, %v936_v8 }
  0xd3   :  { %v259_v19 = vsel %vm249_vm2, %v248_v18, 0.0 }
  0xd5   :  { %376 = vperm.xlu0 %746, %v371_v63  }
  0xd9   :  { %379 = vperm.xlu0 %746, %v372_v0  }
  0xdd   :  { %385 = vperm.xlu0 %746, %v374_v1  }
  0xe1   :  { %474 = vperm.xlu1 %747, %v1012_v45  }
  0xe5   :  { %382 = vperm.xlu1 %747, %v373_v2  }
  0xfc   :  { %257 = vadd.xlane.f32.xlu0 %v256_v15 }
 0x100   :  { %260 = vadd.xlane.f32.xlu0 %v259_v19 }
 0x109   :  { %254 = vadd.xlane.f32.xlu1 %v253_v22 }
 0x134   :  { %v314_v23 = vpop.permute.xlu0 %313 }
 0x135   :  { %v331_v61 = vsub.f32 %v923_v3, %v314_v23 }
 0x137   :  { %v335_v1 = vmul.f32 1.442695, %v331_v61 }
 0x138   :  { %v319_v26 = vpop.permute.xlu0 %318 }
 0x139   :  { %v332_v43 = vsub.f32 %v926_v4, %v319_v26 }
 0x13b   :  { %v337_v51 = vmul.f32 1.442695, %v332_v43 }
 0x13c   :  { %v324_v27 = vpop.permute.xlu0 %323 }
 0x13d   :  { %748 = vpow2.f32 %v337_v51 }
 0x140   :  { %v329_v34 = vpop.permute.xlu0 %328 }
 0x141   :  { %v334_v53 = vsub.f32 %v936_v8, %v329_v34  ;;  %v333_v8 = vsub.f32 %v929_v5, %v324_v27 }
 0x143   :  { %v341_v60 = vmul.f32 1.442695, %v334_v53  ;;  %v339_v14 = vmul.f32 1.442695, %v333_v8 }
 0x144   :  { %v470_v35 = vpop.permute.xlu0 %469 }
 0x145   :  { %750 = vpow2.f32 %v341_v60  ;;  %v487_v9 = vsub.f32 %v943_v12, %v470_v35 }
 0x146   :  { %752 = vpow2.f32 %v335_v1 }
 0x147   :  { %v491_v20 = vmul.f32 1.442695, %v487_v9  ;;  %754 = vpow2.f32 %v339_v14 }
 0x148   :  { %v480_v42 = vpop.permute.xlu0 %479 }
 0x149   :  { %v489_v23 = vsub.f32 %v953_v16, %v480_v42  ;;  %756 = vpow2.f32 %v491_v20  ;;  %v299_v20 = vmul.f32 1.442695, %v295_v32 }
 0x14a   :  { %v749_v22 = vpop.eup %748 }
 0x14b   :  { %v346_v43 = vsel %vm249_vm2, %v749_v22, 0.0  ;;  %v400_v22 = vld [vmem:[#allocation7 + $0x8] sm:$0xff] }
 0x14c   :  { %v485_v50 = vpop.permute.xlu0 %484 }
 0x14d   :  { %v490_v19 = vsub.f32 %v956_v17, %v485_v50  ;;  %v495_v50 = vmul.f32 1.442695, %v489_v23 }
 0x14f   :  { %v497_v27 = vmul.f32 1.442695, %v490_v19  ;;  %v399_v19 = vld [vmem:[#allocation7] sm:$0xff] }
 0x150   :  { %v377_v58 = vpop.permute.xlu0 %376 }
 0x151   :  { %vm387_vm8 = vcmp.eq.s32.totalorder %v1042_v57, %v377_v58 }
 0x152   :  { %v731_v62 = vsel %vm387_vm8, 1.0, %v815_v59 }
 0x153   :  { %v403_v63 = vmul.f32 %v731_v62, %v943_v12 }
 0x154   :  { %v380_v0 = vpop.permute.xlu0 %379 }
 0x155   :  { %vm388_vm9 = vcmp.eq.s32.totalorder %v1042_v57, %v380_v0  ;;  %v407_v4 = vsel %vm249_vm2, %v403_v63, 0.0 }
 0x156   :  { %v732_v2 = vsel %vm388_vm9, 1.0, %v815_v59  ;;  %408 = vadd.xlane.f32.xlu1 %v407_v4 }
 0x157   :  { %v404_v7 = vmul.f32 %v732_v2, %v946_v13  ;;  %v243_v2 = vld [vmem:[#allocation4 + $0x10] sm:$0xff] }
 0x158   :  { %v386_v3 = vpop.permute.xlu0 %385 }
 0x159   :  { %vm390_vm10 = vcmp.eq.s32.totalorder %v1042_v57, %v386_v3  ;;  %v252_v10 = vpop.xlane.xlu1 %251  ;;  %v410_v11 = vsel %vm249_vm2, %v404_v7, 0.0  ;;  %v244_v3 = vld [vmem:[#allocation4 + $0x18] sm:$0xff] }
 0x15a   :  { %v734_v15 = vsel %vm390_vm10, 1.0, %v815_v59  ;;  %v262_v18 = vadd.f32 %v252_v10, %v241_v6  ;;  %411 = vadd.xlane.f32.xlu0 %v410_v11  ;;  %v242_v11 = vld [vmem:[#allocation4 + $0x8] sm:$0xff] }
 0x15b   :  { %v406_v5 = vmul.f32 %v734_v15, %v956_v17  ;;  %v751_v17 = vpop.eup %750 }
 0x15c   :  { %267 = vst.msk [vmem:[#allocation4] sm:$0xff] %vm266_vm3, %v262_v18  ;;  %v753_v58 = vpop.eup %752  ;;  %v301_v18 = vmul.f32 1.442695, %v296_v40 }
 0x15d   :  { %v475_v21 = vpop.permute.xlu1 %474  ;;  %v416_v12 = vsel %vm249_vm2, %v406_v5, 0.0  ;;  %v343_v60 = vsel %vm249_vm2, %v753_v58, 0.0  ;;  %v755_v61 = vpop.eup %754  ;;  %v305_v5 = vmul.f32 1.442695, %v298_v41  ;;  %v292_v41 = vld [vmem:[#allocation3 + $0x8] sm:$0xff] }
 0x15e   :  { %v488_v26 = vsub.f32 %v946_v13, %v475_v21  ;;  %417 = vadd.xlane.f32.xlu0 %v416_v12  ;;  %v352_v13 = vsel %vm249_vm2, %v751_v17, 0.0  ;;  %v757_v62 = vpop.eup %756 }
 0x15f   :  { %v499_v0 = vsel %vm249_vm2, %v757_v62, 0.0 }
 0x160   :  { %v493_v34 = vmul.f32 1.442695, %v488_v26 }
 0x161   :  { %v383_v35 = vpop.permute.xlu1 %382 }
 0x162   :  { %758 = vpow2.f32 %v493_v34  ;;  %vm389_vm11 = vcmp.eq.s32.totalorder %v1042_v57, %v383_v35  ;;  %347 = vadd.xlane.f32.xlu0 %v346_v43  ;;  %v349_v57 = vsel %vm249_vm2, %v755_v61, 0.0  ;;  %v293_v35 = vld [vmem:[#allocation3 + $0x10] sm:$0xff] }
 0x163   :  { %v733_v51 = vsel %vm389_vm11, 1.0, %v815_v59  ;;  %760 = vpow2.f32 %v497_v27  ;;  %v291_v27 = vld [vmem:[#allocation3] sm:$0xff] }
 0x164   :  { %v405_v42 = vmul.f32 %v733_v51, %v953_v16  ;;  %762 = vpow2.f32 %v495_v50  ;;  %v448_v50 = vld [vmem:[#allocation6 + $0x8] sm:$0xff] }
 0x165   :  { %764 = vpow2.f32 %v301_v18 }
 0x166   :  { %353 = vadd.xlane.f32.xlu0 %v352_v13  ;;  %v413_v53 = vsel %vm249_vm2, %v405_v42, 0.0  ;;  %766 = vpow2.f32 %v305_v5 }
 0x167   :  { %414 = vadd.xlane.f32.xlu1 %v413_v53  ;;  %768 = vpow2.f32 %v299_v20  ;;  %v447_v53 = vld [vmem:[#allocation6] sm:$0xff] }
 0x168   :  { %770 = vpow2.f32 %v303_v30 }
 0x169   :  { %772 = vpow2.f32 %v457_v31 }
 0x16a   :  { %774 = vpow2.f32 %v455_v28 }
 0x16b   :  { %344 = vadd.xlane.f32.xlu1 %v343_v60  ;;  %776 = vpow2.f32 %v461_v25 }
 0x16c   :  { %778 = vpow2.f32 %v459_v39 }
 0x16f   :  { %v759_v63 = vpop.eup %758  ;;  %350 = vadd.xlane.f32.xlu1 %v349_v57  ;;  %v450_v57 = vld [vmem:[#allocation6 + $0x18] sm:$0xff] }
 0x170   :  { %v502_v59 = vsel %vm249_vm2, %v759_v63, 0.0  ;;  %v761_v16 = vpop.eup %760 }
 0x171   :  { %503 = vadd.xlane.f32.xlu0 %v502_v59  ;;  %v763_v4 = vpop.eup %762  ;;  %v508_v1 = vsel %vm249_vm2, %v761_v16, 0.0 }
 0x172   :  { %v505_v8 = vsel %vm249_vm2, %v763_v4, 0.0  ;;  %v765_v24 = vpop.eup %764  ;;  %v449_v4 = vld [vmem:[#allocation6 + $0x10] sm:$0xff] }
 0x173   :  { %500 = vadd.xlane.f32.xlu1 %v499_v0  ;;  %v308_v29 = vmul.f32 %v765_v24, %v292_v41  ;;  %v767_v33 = vpop.eup %766 }
 0x174   :  { %v310_v48 = vmul.f32 %v767_v33, %v294_v38  ;;  %v769_v54 = vpop.eup %768 }
 0x175   :  { %509 = vadd.xlane.f32.xlu0 %v508_v1  ;;  %v307_v46 = vmul.f32 %v769_v54, %v291_v27  ;;  %v771_v52 = vpop.eup %770 }
 0x176   :  { %v773_v17 = vpop.eup %772  ;;  %v309_v51 = vmul.f32 %v771_v52, %v293_v35 }
 0x177   :  { %506 = vadd.xlane.f32.xlu1 %v505_v8  ;;  %v775_v42 = vpop.eup %774  ;;  %v464_v60 = vmul.f32 %v773_v17, %v448_v50 }
 0x178   :  { %v777_v61 = vpop.eup %776  ;;  %v463_v59 = vmul.f32 %v775_v42, %v447_v53 }
 0x179   :  { %v779_v16 = vpop.eup %778  ;;  %v466_v8 = vmul.f32 %v777_v61, %v450_v57 }
 0x185   :  { %v258_v6 = vpop.xlane.xlu0 %257 }
 0x186   :  { %v264_v7 = vadd.f32 %v258_v6, %v243_v2 }
 0x188   :  { %269 = vst.msk [vmem:[#allocation4 + $0x10] sm:$0xff] %vm266_vm3, %v264_v7  ;;  %v465_v7 = vmul.f32 %v779_v16, %v449_v4 }
 0x189   :  { %v261_v9 = vpop.xlane.xlu0 %260 }
 0x18a   :  { %v265_v10 = vadd.f32 %v261_v9, %v244_v3 }
 0x18c   :  { %270 = vst.msk [vmem:[#allocation4 + $0x18] sm:$0xff] %vm266_vm3, %v265_v10 }
 0x192   :  { %v255_v14 = vpop.xlane.xlu1 %254 }
 0x193   :  { %v263_v15 = vadd.f32 %v255_v14, %v242_v11 }
 0x195   :  { %268 = vst.msk [vmem:[#allocation4 + $0x8] sm:$0xff] %vm266_vm3, %v263_v15 }
 0x1df   :  { %v409_v21 = vpop.xlane.xlu1 %408 }
 0x1e0   :  { %v419_v12 = vadd.f32 %v409_v21, %v399_v19 }
 0x1e2   :  { %423 = vst.msk [vmem:[#allocation7] sm:$0xff] %vm266_vm3, %v419_v12 }
 0x1e3   :  { %v412_v36 = vpop.xlane.xlu0 %411 }
 0x1e4   :  { %v420_v40 = vadd.f32 %v412_v36, %v400_v22 }
 0x1e6   :  { %424 = vst.msk [vmem:[#allocation7 + $0x8] sm:$0xff] %vm266_vm3, %v420_v40 }
 0x1e7   :  { %v418_v32 = vpop.xlane.xlu0 %417 }
 0x1e8   :  { %v422_v23 = vadd.f32 %v418_v32, %v402_v37 }
 0x1ea   :  { %426 = vst.msk [vmem:[#allocation7 + $0x18] sm:$0xff] %vm266_vm3, %v422_v23 }
 0x1eb   :  { %v348_v45 = vpop.xlane.xlu0 %347 }
 0x1ec   :  { %v356_v44 = vadd.f32 %v348_v45, %v308_v29 }
 0x1ee   :  { %360 = vst.msk [vmem:[#allocation3 + $0x8] sm:$0xff] %vm266_vm3, %v356_v44 }
 0x1ef   :  { %v354_v47 = vpop.xlane.xlu0 %353 }
 0x1f0   :  { %v358_v56 = vadd.f32 %v354_v47, %v310_v48  ;;  %v415_v26 = vpop.xlane.xlu1 %414 }
 0x1f1   :  { %v421_v34 = vadd.f32 %v415_v26, %v401_v49 }
 0x1f2   :  { %362 = vst.msk [vmem:[#allocation3 + $0x18] sm:$0xff] %vm266_vm3, %v358_v56 }
 0x1f3   :  { %425 = vst.msk [vmem:[#allocation7 + $0x10] sm:$0xff] %vm266_vm3, %v421_v34 }
 0x1f4   :  { %v345_v55 = vpop.xlane.xlu1 %344 }
 0x1f5   :  { %v355_v43 = vadd.f32 %v345_v55, %v307_v46 }
 0x1f7   :  { %359 = vst.msk [vmem:[#allocation3] sm:$0xff] %vm266_vm3, %v355_v43 }
 0x1f8   :  { %v351_v13 = vpop.xlane.xlu1 %350 }
 0x1f9   :  { %v357_v58 = vadd.f32 %v351_v13, %v309_v51 }
 0x1fa   :  { %v504_v62 = vpop.xlane.xlu0 %503 }
 0x1fb   :  { %361 = vst.msk [vmem:[#allocation3 + $0x10] sm:$0xff] %vm266_vm3, %v357_v58  ;;  %v512_v63 = vadd.f32 %v504_v62, %v464_v60 }
 0x1fc   :  { %v501_v0 = vpop.xlane.xlu1 %500 }
 0x1fd   :  { %516 = vst.msk [vmem:[#allocation6 + $0x8] sm:$0xff] %vm266_vm3, %v512_v63  ;;  %v511_v1 = vadd.f32 %v501_v0, %v463_v59 }
 0x1fe   :  { %v510_v2 = vpop.xlane.xlu0 %509 }
 0x1ff   :  { %515 = vst.msk [vmem:[#allocation6] sm:$0xff] %vm266_vm3, %v511_v1  ;;  %v514_v6 = vadd.f32 %v510_v2, %v466_v8 }
 0x200   :  { %v507_v3 = vpop.xlane.xlu1 %506 }
 0x201   :  { %518 = vst.msk [vmem:[#allocation6 + $0x18] sm:$0xff] %vm266_vm3, %v514_v6  ;;  %v513_v9 = vadd.f32 %v507_v3, %v465_v7 }
 0x203   :  { %517 = vst.msk [vmem:[#allocation6 + $0x10] sm:$0xff] %vm266_vm3, %v513_v9 }
 0x204 PF:  { %524 = sbr.rel (!%p724_p6) target bundleno = 564 (0x234), region = 41  ;;  %v549_v10 = vld [vmem:[#allocation3] sm:$0xff] (%p724_p6)  ;;  %v550_v11 = vld [vmem:[#allocation3 + $0x8] sm:$0xff] (%p724_p6)  ;;  %v551_v14 = vld [vmem:[#allocation3 + $0x10] sm:$0xff] (%p724_p6)  ;;  %v525_v20 = vlaneseq (%p724_p6)  ;;  %vm578_vm13 = vcmask (%p724_p6), 7168   ;;  %vm599_vm6 = vcmask (%p724_p6), 1041409  }
 0x205   :  { %v552_v15 = vld [vmem:[#allocation3 + $0x18] sm:$0xff] (%p724_p6)  ;;  %780 = vlog2.f32 (%p724_p6), %v549_v10  ;;  %v624_v5 = vld [vmem:[#allocation6 + $0x8] sm:$0xff] (%p724_p6)  ;;  %v735_v36 = vld [vmem:[%s1210_s1] ss:$0 sm:$0xff] (%p724_p6) }
 0x206   :  { %782 = vlog2.f32 (%p724_p6), %v550_v11  ;;  %v623_v18 = vld [vmem:[#allocation6] sm:$0xff] (%p724_p6)  ;;  %v1142_v12 = vshrl.u32 (%p724_p6), %v525_v20, 7  ;;  %v546_v24 = vld [vmem:[#allocation2 + $0x8] sm:$0xff] (%p724_p6)  ;;  %v547_v41 = vld [vmem:[#allocation2 + $0x10] sm:$0xff] (%p724_p6) }
 0x207   :  { %784 = vlog2.f32 (%p724_p6), %v551_v14  ;;  %v545_v40 = vld [vmem:[#allocation2] sm:$0xff] (%p724_p6)  ;;  %v548_v39 = vld [vmem:[#allocation2 + $0x18] sm:$0xff] (%p724_p6)  ;;  %v566_v44 = vld [vmem:[#allocation4 + $0x8] sm:$0xff] (%p724_p6) }
 0x208   :  { %786 = vlog2.f32 (%p724_p6), %v552_v15  ;;  %v626_v21 = vld [vmem:[#allocation6 + $0x18] sm:$0xff] (%p724_p6)  ;;  %v1145_v30 = vadd.s32 (%p724_p6), 8, %v1142_v12  ;;  %v736_v37 = vld [vmem:[%s1210_s1 + $0x1] ss:$0 sm:$0xff] (%p724_p6)  ;;  %v1156_v29 = vld [vmem:[%s1211_s2] ss:$0 sm:$0xff] (%p724_p6)  ;;  %vm541_vm12 = vcmp.lt.s32.totalorder (%p724_p6), %v1142_v12, %v735_v36 }
 0x209   :  { %788 = vlog2.f32 %v623_v18  ;;  %v565_v25 = vld [vmem:[#allocation4] sm:$0xff]  ;;  %vm543_vm15 = vcmp.lt.s32.totalorder %v1142_v12, %v736_v37  ;;  %v567_v47 = vld [vmem:[#allocation4 + $0x10] sm:$0xff]  ;;  %v568_v27 = vld [vmem:[#allocation4 + $0x18] sm:$0xff]  ;;  %vm615_vm2 = vcmp.lt.s32.totalorder %v1142_v12, %v1156_v29 }
 0x20a   :  { %v625_v19 = vld [vmem:[#allocation6 + $0x10] sm:$0xff]  ;;  %790 = vlog2.f32 %v624_v5  ;;  %vm542_vm14 = vcmp.lt.s32.totalorder %v1145_v30, %v735_v36  ;;  %v738_v54 = vld [vmem:[%s1211_s2 + $0x1] ss:$0 sm:$0xff]  ;;  %vm544_vm1 = vcmp.lt.s32.totalorder %v1145_v30, %v736_v37  ;;  %vm616_vm3 = vcmp.lt.s32.totalorder %v1145_v30, %v1156_v29  ;;  %v620_v42 = vld [vmem:[#allocation5 + $0x8] sm:$0xff] }
 0x20b   :  { %792 = vlog2.f32 %v625_v19  ;;  %v619_v35 = vld [vmem:[#allocation5] sm:$0xff]  ;;  %vm617_vm4 = vcmp.lt.s32.totalorder %v1142_v12, %v738_v54  ;;  %v621_v13 = vld [vmem:[#allocation5 + $0x10] sm:$0xff]  ;;  %v622_v57 = vld [vmem:[#allocation5 + $0x18] sm:$0xff]  ;;  %vm618_vm5 = vcmp.lt.s32.totalorder %v1145_v30, %v738_v54 }
 0x20c   :  { %794 = vlog2.f32 %v626_v21  ;;  %v639_v59 = vld [vmem:[#allocation7] sm:$0xff]  ;;  %v640_v8 = vld [vmem:[#allocation7 + $0x8] sm:$0xff]  ;;  %v641_v9 = vld [vmem:[#allocation7 + $0x10] sm:$0xff] }
 0x20d   :  { %v642_v10 = vld [vmem:[#allocation7 + $0x18] sm:$0xff] }
 0x212   :  { %v781_v22 = vpop.eup %780 }
 0x213   :  { %v783_v31 = vpop.eup %782  ;;  %v554_v28 = vmul.f32 0.6931472, %v781_v22 }
 0x214   :  { %v785_v32 = vpop.eup %784  ;;  %v556_v23 = vmul.f32 0.6931472, %v783_v31 }
 0x215   :  { %v787_v33 = vpop.eup %786  ;;  %v558_v45 = vmul.f32 0.6931472, %v785_v32  ;;  %v561_v38 = vadd.f32 %v554_v28, %v545_v40 }
 0x216   :  { %v560_v48 = vmul.f32 0.6931472, %v787_v33  ;;  %v562_v49 = vadd.f32 %v556_v23, %v546_v24  ;;  %v789_v56 = vpop.eup %788 }
 0x217   :  { %v563_v26 = vadd.f32 %v558_v45, %v547_v41  ;;  %v569_v34 = vsub.f32 %v561_v38, %v565_v25  ;;  %v791_v46 = vpop.eup %790  ;;  %v628_v43 = vmul.f32 0.6931472, %v789_v56 }
 0x218   :  { %v564_v52 = vadd.f32 %v560_v48, %v548_v39  ;;  %v570_v55 = vsub.f32 %v562_v49, %v566_v44  ;;  %v793_v17 = vpop.eup %792  ;;  %v630_v53 = vmul.f32 0.6931472, %v791_v46 }
 0x219   :  { %v571_v50 = vsub.f32 %v563_v26, %v567_v47  ;;  %v573_v51 = vsel %vm541_vm12, %v569_v34, 0.0  ;;  %v795_v58 = vpop.eup %794  ;;  %v632_v63 = vmul.f32 0.6931472, %v793_v17  ;;  %v635_v1 = vadd.f32 %v628_v43, %v619_v35  ;;  %v577_v34 = vld [vmem:[%s1216_s7] sm:$0x3] }
 0x21a   :  { %v572_v60 = vsub.f32 %v564_v52, %v568_v27  ;;  %v574_v61 = vsel %vm542_vm14, %v570_v55, 0.0  ;;  %v579_v62 = vsel %vm578_vm13, %v573_v51, 0.0  ;;  %v634_v4 = vmul.f32 0.6931472, %v795_v58 }
 0x21b   :  { %v575_v16 = vsel %vm543_vm15, %v571_v50, 0.0  ;;  %v580_v0 = vsel %vm578_vm13, %v574_v61, 0.0  ;;  %v636_v3 = vadd.f32 %v630_v53, %v620_v42  ;;  %v637_v14 = vadd.f32 %v632_v63, %v621_v13  ;;  %v651_v13 = vld [vmem:[%s1217_s8] sm:$0x3] }
 0x21c   :  { %v576_v2 = vsel %vm544_vm1, %v572_v60, 0.0  ;;  %v581_v6 = vadd.f32 %v580_v0, %v579_v62  ;;  %v588_v7 = vsel %vm578_vm13, %v575_v16, 0.0  ;;  %v638_v15 = vadd.f32 %v634_v4, %v622_v57 }
 0x21d   :  { %v589_v11 = vsel %vm578_vm13, %v576_v2, 0.0  ;;  %v643_v18 = vsub.f32 %v635_v1, %v639_v59  ;;  %v644_v20 = vsub.f32 %v636_v3, %v640_v8  ;;  %v645_v21 = vsub.f32 %v637_v14, %v641_v9 }
 0x21e   :  { %v582_v5 = vrot.slane %v581_v6, 4  ;;  %v590_v19 = vadd.f32 %v589_v11, %v588_v7  ;;  %v646_v22 = vsub.f32 %v638_v15, %v642_v10 }
 0x21f   :  { %v647_v36 = vsel %vm615_vm2, %v643_v18, 0.0  ;;  %v648_v37 = vsel %vm616_vm3, %v644_v20, 0.0  ;;  %v649_v28 = vsel %vm617_vm4, %v645_v21, 0.0 }
 0x220   :  { %v583_v40 = vadd.f32 %v582_v5, %v581_v6  ;;  %v591_v31 = vrot.slane %v590_v19, 4  ;;  %v652_v24 = vsel %vm578_vm13, %v647_v36, 0.0  ;;  %v650_v32 = vsel %vm618_vm5, %v646_v22, 0.0 }
 0x221   :  { %v653_v41 = vsel %vm578_vm13, %v648_v37, 0.0  ;;  %v661_v39 = vsel %vm578_vm13, %v649_v28, 0.0  ;;  %v662_v45 = vsel %vm578_vm13, %v650_v32, 0.0 }
 0x222   :  { %v584_v23 = vrot.slane %v583_v40, 2  ;;  %v592_v25 = vadd.f32 %v591_v31, %v590_v19  ;;  %v654_v33 = vadd.f32 %v653_v41, %v652_v24  ;;  %v663_v30 = vadd.f32 %v662_v45, %v661_v39 }
 0x224   :  { %v585_v38 = vadd.f32 %v584_v23, %v583_v40  ;;  %v593_v44 = vrot.slane %v592_v25, 2  ;;  %v655_v48 = vrot.slane %v654_v33, 4  ;;  %v664_v56 = vrot.slane %v663_v30, 4 }
 0x226   :  { %v586_v29 = vrot.slane %v585_v38, 1  ;;  %v594_v49 = vadd.f32 %v593_v44, %v592_v25  ;;  %v656_v47 = vadd.f32 %v655_v48, %v654_v33  ;;  %v665_v27 = vadd.f32 %v664_v56, %v663_v30 }
 0x228   :  { %v587_v12 = vadd.f32 %v586_v29, %v585_v38  ;;  %v595_v54 = vrot.slane %v594_v49, 1  ;;  %v657_v26 = vrot.slane %v656_v47, 2  ;;  %v666_v55 = vrot.slane %v665_v27, 2 }
 0x22a   :  { %v596_v46 = vadd.f32 %v595_v54, %v594_v49  ;;  %v658_v52 = vadd.f32 %v657_v26, %v656_v47  ;;  %v667_v17 = vadd.f32 %v666_v55, %v665_v27 }
 0x22c   :  { %v600_v35 = vsel %vm599_vm6, %v596_v46, %v587_v12  ;;  %v659_v43 = vrot.slane %v658_v52, 1  ;;  %v668_v42 = vrot.slane %v667_v17, 1 }
 0x22d   :  { %v602_v50 = vadd.f32 %v600_v35, %v577_v34 }
 0x22e   :  { %v660_v51 = vadd.f32 %v659_v43, %v658_v52  ;;  %v669_v53 = vadd.f32 %v668_v42, %v667_v17 }
 0x22f   :  { %604 = vst.msk [vmem:[%s1216_s7] sm:$0x3] %vm169_vm0, %v602_v50 }
 0x230   :  { %v672_v58 = vsel %vm599_vm6, %v669_v53, %v660_v51 }
 0x231   :  { %v674_v60 = vadd.f32 %v672_v58, %v651_v13 }
 0x233   :  { %675 = vst.msk [vmem:[%s1217_s8] sm:$0x3] %vm169_vm0, %v674_v60 }
 0x234 PF:  {}

</bundles_post_ra>
